<compile_context>
chip_gen: v7x
topology: tpu7x:2x2x1
jax: 0.10.0
libtpu: 0.0.40
codegen_flags: <defaults>
</compile_context>

<pallas_src>
import jax
import jax.numpy as jnp
from jax.experimental import pallas as pl
from jax.experimental.pallas import tpu as pltpu

NUM_INPUT = 12
NUM_HIDDEN = 128
NUM_OUTPUT = 12

RECURRENT_MATMUL_DTYPE = jnp.bfloat16   # MXU-native; state & activations stay f32


def lstm_recurrence_kernel(xg_ref, whh_ref, wfc_ref, bfc_ref, out_ref):
    """xg_ref:  (T, B, 4H) f32   precomputed x @ W_ih^T + (b_ih + b_hh), time-major
       whh_ref: (H, 4H)   bf16   recurrent weight (pre-transposed)
       wfc_ref: (H, OUT)  f32    fc weight (pre-transposed)
       bfc_ref: (1, OUT)  f32    fc bias
       out_ref: (B, OUT)  f32    fc(h_T)                                      """
    T, B, _ = xg_ref.shape
    H = whh_ref.shape[0]
    whh = whh_ref[...]                                    # (H, 4H) bf16

    h = jnp.zeros((B, H), jnp.float32)
    c = jnp.zeros((B, H), jnp.float32)

    # T is small and static -> fully unrolled recurrence; h/c are loop-carried vregs.
    for t in range(T):
        gates = xg_ref[t] + jnp.dot(h.astype(whh.dtype), whh,
                                    preferred_element_type=jnp.float32)   # (B, 4H)
        i = jax.nn.sigmoid(gates[:, 0 * H:1 * H])
        f = jax.nn.sigmoid(gates[:, 1 * H:2 * H])
        g = jnp.tanh(gates[:, 2 * H:3 * H])
        o = jax.nn.sigmoid(gates[:, 3 * H:4 * H])
        c = f * c + i * g
        h = o * jnp.tanh(c)

    # fc applied to the last timestep only (fc(out)[:, -1, :] == fc(h_T)).
    out_ref[...] = (jnp.dot(h, wfc_ref[...], preferred_element_type=jnp.float32)
                    + bfc_ref[...]).astype(out_ref.dtype)


def prepare_params(params):
    """One-time preprocessing: transposes, bias fold, matmul-dtype cast."""
    H = NUM_HIDDEN
    return {
        "wih_t": params["w_ih"].T,                                   # (D, 4H) f32
        "whh_t": params["w_hh"].T.astype(RECURRENT_MATMUL_DTYPE),    # (H, 4H) bf16
        "bias": (params["b_ih"] + params["b_hh"]).reshape(1, 1, 4 * H),
        "wfc_t": params["w_fc"].T,                                   # (H, OUT) f32
        "bfc": params["b_fc"].reshape(1, NUM_OUTPUT),
    }


@jax.jit
def net_forward(x, prep):
    """x: (B, T, D) float32, batch_first like PyTorch. Returns (B, NUM_OUTPUT)."""
    B, T, D = x.shape
    # Batched input projection for all timesteps at once; output is emitted
    # time-major so the kernel reads xg[t] with a cheap leading-dim index.
    xg = jnp.einsum("btd,dg->tbg", x, prep["wih_t"]) + prep["bias"]   # (T, B, 4H) f32

    vmem = pl.BlockSpec(memory_space=pltpu.MemorySpace.VMEM)
    out = pl.pallas_call(
        lstm_recurrence_kernel,
        out_shape=jax.ShapeDtypeStruct((B, NUM_OUTPUT), jnp.float32),
        in_specs=[vmem, vmem, vmem, vmem],
        out_specs=vmem,
    )(xg, prep["whh_t"], prep["wfc_t"], prep["bfc"])
    return out
    # TODO(synk): for real throughput, stack sequences so B >= 128/256 and add a
    # 'parallel' batch-tile grid axis (2 TensorCores on v7x); trivial here at B=4.


def net_forward_ref(x, params):
    """Pure-JAX f32 reference matching PyTorch nn.LSTM(batch_first) + fc."""
    H = NUM_HIDDEN
    B, T, D = x.shape
    b = params["b_ih"] + params["b_hh"]

    def step(carry, x_t):
        h, c = carry
        gates = x_t @ params["w_ih"].T + h @ params["w_hh"].T + b
        i = jax.nn.sigmoid(gates[:, 0 * H:1 * H])
        f = jax.nn.sigmoid(gates[:, 1 * H:2 * H])
        g = jnp.tanh(gates[:, 2 * H:3 * H])
        o = jax.nn.sigmoid(gates[:, 3 * H:4 * H])
        c = f * c + i * g
        h = o * jnp.tanh(c)
        return (h, c), None

    h0 = jnp.zeros((B, H), jnp.float32)
    c0 = jnp.zeros((B, H), jnp.float32)
    (h_T, _), _ = jax.lax.scan(step, (h0, c0), jnp.transpose(x, (1, 0, 2)))
    return h_T @ params["w_fc"].T + params["b_fc"]


def init_params(key):
    """Deterministic init mirroring PyTorch's uniform(-1/sqrt(H), 1/sqrt(H))."""
    H, D, O = NUM_HIDDEN, NUM_INPUT, NUM_OUTPUT
    k = 1.0 / jnp.sqrt(jnp.float32(H))
    ks = jax.random.split(key, 6)
    u = lambda kk, shape: jax.random.uniform(kk, shape, jnp.float32, -k, k)
    return {
        "w_ih": u(ks[0], (4 * H, D)),
        "w_hh": u(ks[1], (4 * H, H)),
        "b_ih": u(ks[2], (4 * H,)),
        "b_hh": u(ks[3], (4 * H,)),
        "w_fc": u(ks[4], (O, H)),
        "b_fc": u(ks[5], (O,)),
    }


if __name__ == "__main__":
    key = jax.random.PRNGKey(0)
    k_param, k_x = jax.random.split(key)
    params = init_params(k_param)
    prep = prepare_params(params)           # one-time param preprocessing

    B, T, D = 4, 8, NUM_INPUT
    x = jax.random.normal(k_x, (B, T, D), jnp.float32)

    out = net_forward(x, prep)
    out = jax.block_until_ready(out)
    assert out.shape == (B, NUM_OUTPUT)

    # Sanity check vs f32 reference (loose tol: recurrent weights are bf16 by design).
    ref = net_forward_ref(x, params)
    max_err = float(jnp.max(jnp.abs(out - ref)))
    assert max_err < 5e-2, f"max abs error {max_err}"

    print("KERNEL_OK")
</pallas_src>

<mosaic_0001>
module attributes {stable_mosaic.version = 11 : i64} {
  func.func @lstm_recurrence_kernel(%arg0: memref<8x4x512xf32, #tpu.memory_space<vmem>>, %arg1: memref<128x512xbf16, #tpu.memory_space<vmem>>, %arg2: memref<128x12xf32, #tpu.memory_space<vmem>>, %arg3: memref<1x12xf32, #tpu.memory_space<vmem>>, %arg4: memref<4x12xf32, #tpu.memory_space<vmem>>) attributes {dimension_semantics = [], scalar_prefetch = 0 : i64, scratch_operands = 0 : i64, tpu.core_type = #tpu.core_type<tc>} {
    %c0 = arith.constant 0 : index
    %c0_0 = arith.constant 0 : index
    %0 = vector.load %arg1[%c0, %c0_0] : memref<128x512xbf16, #tpu.memory_space<vmem>>, vector<128x512xbf16>
    %cst = arith.constant 0.000000e+00 : f32
    %1 = vector.broadcast %cst : f32 to vector<4x128xf32>
    %cst_1 = arith.constant 0.000000e+00 : f32
    %2 = vector.broadcast %cst_1 : f32 to vector<4x128xf32>
    %c0_2 = arith.constant 0 : index
    %c0_3 = arith.constant 0 : index
    %c0_4 = arith.constant 0 : index
    %3 = vector.load %arg0[%c0_2, %c0_3, %c0_4] : memref<8x4x512xf32, #tpu.memory_space<vmem>>, vector<1x4x512xf32>
    %4 = vector.shape_cast %3 : vector<1x4x512xf32> to vector<4x512xf32>
    %5 = arith.truncf %1 : vector<4x128xf32> to vector<4x128xbf16>
    %cst_5 = arith.constant dense<0.000000e+00> : vector<4x512xf32>
    %6 = tpu.matmul %5, %0, %cst_5 {dimension_numbers = #tpu.dot_dimension_numbers<[1], [0], [0], [1], [0, 0, 1, 1], [], []>} : vector<4x128xbf16>, vector<128x512xbf16>, vector<4x512xf32> -> vector<4x512xf32>
    %7 = arith.addf %4, %6 : vector<4x512xf32>
    %8 = vector.extract_strided_slice %7 {offsets = [0, 0], sizes = [4, 128], strides = [1, 1]} : vector<4x512xf32> to vector<4x128xf32>
    %9 = arith.negf %8 : vector<4x128xf32>
    %10 = math.exp %9 : vector<4x128xf32>
    %cst_6 = arith.constant 1.000000e+00 : f32
    %11 = vector.broadcast %cst_6 : f32 to vector<4x128xf32>
    %12 = arith.addf %11, %10 : vector<4x128xf32>
    %13 = arith.divf %11, %12 : vector<4x128xf32>
    %14 = vector.extract_strided_slice %7 {offsets = [0, 128], sizes = [4, 128], strides = [1, 1]} : vector<4x512xf32> to vector<4x128xf32>
    %15 = arith.negf %14 : vector<4x128xf32>
    %16 = math.exp %15 : vector<4x128xf32>
    %cst_7 = arith.constant 1.000000e+00 : f32
    %17 = vector.broadcast %cst_7 : f32 to vector<4x128xf32>
    %18 = arith.addf %17, %16 : vector<4x128xf32>
    %19 = arith.divf %17, %18 : vector<4x128xf32>
    %20 = vector.extract_strided_slice %7 {offsets = [0, 256], sizes = [4, 128], strides = [1, 1]} : vector<4x512xf32> to vector<4x128xf32>
    %21 = math.tanh %20 : vector<4x128xf32>
    %22 = vector.extract_strided_slice %7 {offsets = [0, 384], sizes = [4, 128], strides = [1, 1]} : vector<4x512xf32> to vector<4x128xf32>
    %23 = arith.negf %22 : vector<4x128xf32>
    %24 = math.exp %23 : vector<4x128xf32>
    %cst_8 = arith.constant 1.000000e+00 : f32
    %25 = vector.broadcast %cst_8 : f32 to vector<4x128xf32>
    %26 = arith.addf %25, %24 : vector<4x128xf32>
    %27 = arith.divf %25, %26 : vector<4x128xf32>
    %28 = arith.mulf %19, %2 : vector<4x128xf32>
    %29 = arith.mulf %13, %21 : vector<4x128xf32>
    %30 = arith.addf %28, %29 : vector<4x128xf32>
    %31 = math.tanh %30 : vector<4x128xf32>
    %32 = arith.mulf %27, %31 : vector<4x128xf32>
    %c1 = arith.constant 1 : index
    %c0_9 = arith.constant 0 : index
    %c0_10 = arith.constant 0 : index
    %33 = vector.load %arg0[%c1, %c0_9, %c0_10] : memref<8x4x512xf32, #tpu.memory_space<vmem>>, vector<1x4x512xf32>
    %34 = vector.shape_cast %33 : vector<1x4x512xf32> to vector<4x512xf32>
    %35 = arith.truncf %32 : vector<4x128xf32> to vector<4x128xbf16>
    %cst_11 = arith.constant dense<0.000000e+00> : vector<4x512xf32>
    %36 = tpu.matmul %35, %0, %cst_11 {dimension_numbers = #tpu.dot_dimension_numbers<[1], [0], [0], [1], [0, 0, 1, 1], [], []>} : vector<4x128xbf16>, vector<128x512xbf16>, vector<4x512xf32> -> vector<4x512xf32>
    %37 = arith.addf %34, %36 : vector<4x512xf32>
    %38 = vector.extract_strided_slice %37 {offsets = [0, 0], sizes = [4, 128], strides = [1, 1]} : vector<4x512xf32> to vector<4x128xf32>
    %39 = arith.negf %38 : vector<4x128xf32>
    %40 = math.exp %39 : vector<4x128xf32>
    %cst_12 = arith.constant 1.000000e+00 : f32
    %41 = vector.broadcast %cst_12 : f32 to vector<4x128xf32>
    %42 = arith.addf %41, %40 : vector<4x128xf32>
    %43 = arith.divf %41, %42 : vector<4x128xf32>
    %44 = vector.extract_strided_slice %37 {offsets = [0, 128], sizes = [4, 128], strides = [1, 1]} : vector<4x512xf32> to vector<4x128xf32>
    %45 = arith.negf %44 : vector<4x128xf32>
    %46 = math.exp %45 : vector<4x128xf32>
    %cst_13 = arith.constant 1.000000e+00 : f32
    %47 = vector.broadcast %cst_13 : f32 to vector<4x128xf32>
    %48 = arith.addf %47, %46 : vector<4x128xf32>
    %49 = arith.divf %47, %48 : vector<4x128xf32>
    %50 = vector.extract_strided_slice %37 {offsets = [0, 256], sizes = [4, 128], strides = [1, 1]} : vector<4x512xf32> to vector<4x128xf32>
    %51 = math.tanh %50 : vector<4x128xf32>
    %52 = vector.extract_strided_slice %37 {offsets = [0, 384], sizes = [4, 128], strides = [1, 1]} : vector<4x512xf32> to vector<4x128xf32>
    %53 = arith.negf %52 : vector<4x128xf32>
    %54 = math.exp %53 : vector<4x128xf32>
    %cst_14 = arith.constant 1.000000e+00 : f32
    %55 = vector.broadcast %cst_14 : f32 to vector<4x128xf32>
    %56 = arith.addf %55, %54 : vector<4x128xf32>
    %57 = arith.divf %55, %56 : vector<4x128xf32>
    %58 = arith.mulf %49, %30 : vector<4x128xf32>
    %59 = arith.mulf %43, %51 : vector<4x128xf32>
    %60 = arith.addf %58, %59 : vector<4x128xf32>
    %61 = math.tanh %60 : vector<4x128xf32>
    %62 = arith.mulf %57, %61 : vector<4x128xf32>
    %c2 = arith.constant 2 : index
    %c0_15 = arith.constant 0 : index
    %c0_16 = arith.constant 0 : index
    %63 = vector.load %arg0[%c2, %c0_15, %c0_16] : memref<8x4x512xf32, #tpu.memory_space<vmem>>, vector<1x4x512xf32>
    %64 = vector.shape_cast %63 : vector<1x4x512xf32> to vector<4x512xf32>
    %65 = arith.truncf %62 : vector<4x128xf32> to vector<4x128xbf16>
    %cst_17 = arith.constant dense<0.000000e+00> : vector<4x512xf32>
    %66 = tpu.matmul %65, %0, %cst_17 {dimension_numbers = #tpu.dot_dimension_numbers<[1], [0], [0], [1], [0, 0, 1, 1], [], []>} : vector<4x128xbf16>, vector<128x512xbf16>, vector<4x512xf32> -> vector<4x512xf32>
    %67 = arith.addf %64, %66 : vector<4x512xf32>
    %68 = vector.extract_strided_slice %67 {offsets = [0, 0], sizes = [4, 128], strides = [1, 1]} : vector<4x512xf32> to vector<4x128xf32>
    %69 = arith.negf %68 : vector<4x128xf32>
    %70 = math.exp %69 : vector<4x128xf32>
    %cst_18 = arith.constant 1.000000e+00 : f32
    %71 = vector.broadcast %cst_18 : f32 to vector<4x128xf32>
    %72 = arith.addf %71, %70 : vector<4x128xf32>
    %73 = arith.divf %71, %72 : vector<4x128xf32>
    %74 = vector.extract_strided_slice %67 {offsets = [0, 128], sizes = [4, 128], strides = [1, 1]} : vector<4x512xf32> to vector<4x128xf32>
    %75 = arith.negf %74 : vector<4x128xf32>
    %76 = math.exp %75 : vector<4x128xf32>
    %cst_19 = arith.constant 1.000000e+00 : f32
    %77 = vector.broadcast %cst_19 : f32 to vector<4x128xf32>
    %78 = arith.addf %77, %76 : vector<4x128xf32>
    %79 = arith.divf %77, %78 : vector<4x128xf32>
    %80 = vector.extract_strided_slice %67 {offsets = [0, 256], sizes = [4, 128], strides = [1, 1]} : vector<4x512xf32> to vector<4x128xf32>
    %81 = math.tanh %80 : vector<4x128xf32>
    %82 = vector.extract_strided_slice %67 {offsets = [0, 384], sizes = [4, 128], strides = [1, 1]} : vector<4x512xf32> to vector<4x128xf32>
    %83 = arith.negf %82 : vector<4x128xf32>
    %84 = math.exp %83 : vector<4x128xf32>
    %cst_20 = arith.constant 1.000000e+00 : f32
    %85 = vector.broadcast %cst_20 : f32 to vector<4x128xf32>
    %86 = arith.addf %85, %84 : vector<4x128xf32>
    %87 = arith.divf %85, %86 : vector<4x128xf32>
    %88 = arith.mulf %79, %60 : vector<4x128xf32>
    %89 = arith.mulf %73, %81 : vector<4x128xf32>
    %90 = arith.addf %88, %89 : vector<4x128xf32>
    %91 = math.tanh %90 : vector<4x128xf32>
    %92 = arith.mulf %87, %91 : vector<4x128xf32>
    %c3 = arith.constant 3 : index
    %c0_21 = arith.constant 0 : index
    %c0_22 = arith.constant 0 : index
    %93 = vector.load %arg0[%c3, %c0_21, %c0_22] : memref<8x4x512xf32, #tpu.memory_space<vmem>>, vector<1x4x512xf32>
    %94 = vector.shape_cast %93 : vector<1x4x512xf32> to vector<4x512xf32>
    %95 = arith.truncf %92 : vector<4x128xf32> to vector<4x128xbf16>
    %cst_23 = arith.constant dense<0.000000e+00> : vector<4x512xf32>
    %96 = tpu.matmul %95, %0, %cst_23 {dimension_numbers = #tpu.dot_dimension_numbers<[1], [0], [0], [1], [0, 0, 1, 1], [], []>} : vector<4x128xbf16>, vector<128x512xbf16>, vector<4x512xf32> -> vector<4x512xf32>
    %97 = arith.addf %94, %96 : vector<4x512xf32>
    %98 = vector.extract_strided_slice %97 {offsets = [0, 0], sizes = [4, 128], strides = [1, 1]} : vector<4x512xf32> to vector<4x128xf32>
    %99 = arith.negf %98 : vector<4x128xf32>
    %100 = math.exp %99 : vector<4x128xf32>
    %cst_24 = arith.constant 1.000000e+00 : f32
    %101 = vector.broadcast %cst_24 : f32 to vector<4x128xf32>
    %102 = arith.addf %101, %100 : vector<4x128xf32>
    %103 = arith.divf %101, %102 : vector<4x128xf32>
    %104 = vector.extract_strided_slice %97 {offsets = [0, 128], sizes = [4, 128], strides = [1, 1]} : vector<4x512xf32> to vector<4x128xf32>
    %105 = arith.negf %104 : vector<4x128xf32>
    %106 = math.exp %105 : vector<4x128xf32>
    %cst_25 = arith.constant 1.000000e+00 : f32
    %107 = vector.broadcast %cst_25 : f32 to vector<4x128xf32>
    %108 = arith.addf %107, %106 : vector<4x128xf32>
    %109 = arith.divf %107, %108 : vector<4x128xf32>
    %110 = vector.extract_strided_slice %97 {offsets = [0, 256], sizes = [4, 128], strides = [1, 1]} : vector<4x512xf32> to vector<4x128xf32>
    %111 = math.tanh %110 : vector<4x128xf32>
    %112 = vector.extract_strided_slice %97 {offsets = [0, 384], sizes = [4, 128], strides = [1, 1]} : vector<4x512xf32> to vector<4x128xf32>
    %113 = arith.negf %112 : vector<4x128xf32>
    %114 = math.exp %113 : vector<4x128xf32>
    %cst_26 = arith.constant 1.000000e+00 : f32
    %115 = vector.broadcast %cst_26 : f32 to vector<4x128xf32>
    %116 = arith.addf %115, %114 : vector<4x128xf32>
    %117 = arith.divf %115, %116 : vector<4x128xf32>
    %118 = arith.mulf %109, %90 : vector<4x128xf32>
    %119 = arith.mulf %103, %111 : vector<4x128xf32>
    %120 = arith.addf %118, %119 : vector<4x128xf32>
    %121 = math.tanh %120 : vector<4x128xf32>
    %122 = arith.mulf %117, %121 : vector<4x128xf32>
    %c4 = arith.constant 4 : index
    %c0_27 = arith.constant 0 : index
    %c0_28 = arith.constant 0 : index
    %123 = vector.load %arg0[%c4, %c0_27, %c0_28] : memref<8x4x512xf32, #tpu.memory_space<vmem>>, vector<1x4x512xf32>
    %124 = vector.shape_cast %123 : vector<1x4x512xf32> to vector<4x512xf32>
    %125 = arith.truncf %122 : vector<4x128xf32> to vector<4x128xbf16>
    %cst_29 = arith.constant dense<0.000000e+00> : vector<4x512xf32>
    %126 = tpu.matmul %125, %0, %cst_29 {dimension_numbers = #tpu.dot_dimension_numbers<[1], [0], [0], [1], [0, 0, 1, 1], [], []>} : vector<4x128xbf16>, vector<128x512xbf16>, vector<4x512xf32> -> vector<4x512xf32>
    %127 = arith.addf %124, %126 : vector<4x512xf32>
    %128 = vector.extract_strided_slice %127 {offsets = [0, 0], sizes = [4, 128], strides = [1, 1]} : vector<4x512xf32> to vector<4x128xf32>
    %129 = arith.negf %128 : vector<4x128xf32>
    %130 = math.exp %129 : vector<4x128xf32>
    %cst_30 = arith.constant 1.000000e+00 : f32
    %131 = vector.broadcast %cst_30 : f32 to vector<4x128xf32>
    %132 = arith.addf %131, %130 : vector<4x128xf32>
    %133 = arith.divf %131, %132 : vector<4x128xf32>
    %134 = vector.extract_strided_slice %127 {offsets = [0, 128], sizes = [4, 128], strides = [1, 1]} : vector<4x512xf32> to vector<4x128xf32>
    %135 = arith.negf %134 : vector<4x128xf32>
    %136 = math.exp %135 : vector<4x128xf32>
    %cst_31 = arith.constant 1.000000e+00 : f32
    %137 = vector.broadcast %cst_31 : f32 to vector<4x128xf32>
    %138 = arith.addf %137, %136 : vector<4x128xf32>
    %139 = arith.divf %137, %138 : vector<4x128xf32>
    %140 = vector.extract_strided_slice %127 {offsets = [0, 256], sizes = [4, 128], strides = [1, 1]} : vector<4x512xf32> to vector<4x128xf32>
    %141 = math.tanh %140 : vector<4x128xf32>
    %142 = vector.extract_strided_slice %127 {offsets = [0, 384], sizes = [4, 128], strides = [1, 1]} : vector<4x512xf32> to vector<4x128xf32>
    %143 = arith.negf %142 : vector<4x128xf32>
    %144 = math.exp %143 : vector<4x128xf32>
    %cst_32 = arith.constant 1.000000e+00 : f32
    %145 = vector.broadcast %cst_32 : f32 to vector<4x128xf32>
    %146 = arith.addf %145, %144 : vector<4x128xf32>
    %147 = arith.divf %145, %146 : vector<4x128xf32>
    %148 = arith.mulf %139, %120 : vector<4x128xf32>
    %149 = arith.mulf %133, %141 : vector<4x128xf32>
    %150 = arith.addf %148, %149 : vector<4x128xf32>
    %151 = math.tanh %150 : vector<4x128xf32>
    %152 = arith.mulf %147, %151 : vector<4x128xf32>
    %c5 = arith.constant 5 : index
    %c0_33 = arith.constant 0 : index
    %c0_34 = arith.constant 0 : index
    %153 = vector.load %arg0[%c5, %c0_33, %c0_34] : memref<8x4x512xf32, #tpu.memory_space<vmem>>, vector<1x4x512xf32>
    %154 = vector.shape_cast %153 : vector<1x4x512xf32> to vector<4x512xf32>
    %155 = arith.truncf %152 : vector<4x128xf32> to vector<4x128xbf16>
    %cst_35 = arith.constant dense<0.000000e+00> : vector<4x512xf32>
    %156 = tpu.matmul %155, %0, %cst_35 {dimension_numbers = #tpu.dot_dimension_numbers<[1], [0], [0], [1], [0, 0, 1, 1], [], []>} : vector<4x128xbf16>, vector<128x512xbf16>, vector<4x512xf32> -> vector<4x512xf32>
    %157 = arith.addf %154, %156 : vector<4x512xf32>
    %158 = vector.extract_strided_slice %157 {offsets = [0, 0], sizes = [4, 128], strides = [1, 1]} : vector<4x512xf32> to vector<4x128xf32>
    %159 = arith.negf %158 : vector<4x128xf32>
    %160 = math.exp %159 : vector<4x128xf32>
    %cst_36 = arith.constant 1.000000e+00 : f32
    %161 = vector.broadcast %cst_36 : f32 to vector<4x128xf32>
    %162 = arith.addf %161, %160 : vector<4x128xf32>
    %163 = arith.divf %161, %162 : vector<4x128xf32>
    %164 = vector.extract_strided_slice %157 {offsets = [0, 128], sizes = [4, 128], strides = [1, 1]} : vector<4x512xf32> to vector<4x128xf32>
    %165 = arith.negf %164 : vector<4x128xf32>
    %166 = math.exp %165 : vector<4x128xf32>
    %cst_37 = arith.constant 1.000000e+00 : f32
    %167 = vector.broadcast %cst_37 : f32 to vector<4x128xf32>
    %168 = arith.addf %167, %166 : vector<4x128xf32>
    %169 = arith.divf %167, %168 : vector<4x128xf32>
    %170 = vector.extract_strided_slice %157 {offsets = [0, 256], sizes = [4, 128], strides = [1, 1]} : vector<4x512xf32> to vector<4x128xf32>
    %171 = math.tanh %170 : vector<4x128xf32>
    %172 = vector.extract_strided_slice %157 {offsets = [0, 384], sizes = [4, 128], strides = [1, 1]} : vector<4x512xf32> to vector<4x128xf32>
    %173 = arith.negf %172 : vector<4x128xf32>
    %174 = math.exp %173 : vector<4x128xf32>
    %cst_38 = arith.constant 1.000000e+00 : f32
    %175 = vector.broadcast %cst_38 : f32 to vector<4x128xf32>
    %176 = arith.addf %175, %174 : vector<4x128xf32>
    %177 = arith.divf %175, %176 : vector<4x128xf32>
    %178 = arith.mulf %169, %150 : vector<4x128xf32>
    %179 = arith.mulf %163, %171 : vector<4x128xf32>
    %180 = arith.addf %178, %179 : vector<4x128xf32>
    %181 = math.tanh %180 : vector<4x128xf32>
    %182 = arith.mulf %177, %181 : vector<4x128xf32>
    %c6 = arith.constant 6 : index
    %c0_39 = arith.constant 0 : index
    %c0_40 = arith.constant 0 : index
    %183 = vector.load %arg0[%c6, %c0_39, %c0_40] : memref<8x4x512xf32, #tpu.memory_space<vmem>>, vector<1x4x512xf32>
    %184 = vector.shape_cast %183 : vector<1x4x512xf32> to vector<4x512xf32>
    %185 = arith.truncf %182 : vector<4x128xf32> to vector<4x128xbf16>
    %cst_41 = arith.constant dense<0.000000e+00> : vector<4x512xf32>
    %186 = tpu.matmul %185, %0, %cst_41 {dimension_numbers = #tpu.dot_dimension_numbers<[1], [0], [0], [1], [0, 0, 1, 1], [], []>} : vector<4x128xbf16>, vector<128x512xbf16>, vector<4x512xf32> -> vector<4x512xf32>
    %187 = arith.addf %184, %186 : vector<4x512xf32>
    %188 = vector.extract_strided_slice %187 {offsets = [0, 0], sizes = [4, 128], strides = [1, 1]} : vector<4x512xf32> to vector<4x128xf32>
    %189 = arith.negf %188 : vector<4x128xf32>
    %190 = math.exp %189 : vector<4x128xf32>
    %cst_42 = arith.constant 1.000000e+00 : f32
    %191 = vector.broadcast %cst_42 : f32 to vector<4x128xf32>
    %192 = arith.addf %191, %190 : vector<4x128xf32>
    %193 = arith.divf %191, %192 : vector<4x128xf32>
    %194 = vector.extract_strided_slice %187 {offsets = [0, 128], sizes = [4, 128], strides = [1, 1]} : vector<4x512xf32> to vector<4x128xf32>
    %195 = arith.negf %194 : vector<4x128xf32>
    %196 = math.exp %195 : vector<4x128xf32>
    %cst_43 = arith.constant 1.000000e+00 : f32
    %197 = vector.broadcast %cst_43 : f32 to vector<4x128xf32>
    %198 = arith.addf %197, %196 : vector<4x128xf32>
    %199 = arith.divf %197, %198 : vector<4x128xf32>
    %200 = vector.extract_strided_slice %187 {offsets = [0, 256], sizes = [4, 128], strides = [1, 1]} : vector<4x512xf32> to vector<4x128xf32>
    %201 = math.tanh %200 : vector<4x128xf32>
    %202 = vector.extract_strided_slice %187 {offsets = [0, 384], sizes = [4, 128], strides = [1, 1]} : vector<4x512xf32> to vector<4x128xf32>
    %203 = arith.negf %202 : vector<4x128xf32>
    %204 = math.exp %203 : vector<4x128xf32>
    %cst_44 = arith.constant 1.000000e+00 : f32
    %205 = vector.broadcast %cst_44 : f32 to vector<4x128xf32>
    %206 = arith.addf %205, %204 : vector<4x128xf32>
    %207 = arith.divf %205, %206 : vector<4x128xf32>
    %208 = arith.mulf %199, %180 : vector<4x128xf32>
    %209 = arith.mulf %193, %201 : vector<4x128xf32>
    %210 = arith.addf %208, %209 : vector<4x128xf32>
    %211 = math.tanh %210 : vector<4x128xf32>
    %212 = arith.mulf %207, %211 : vector<4x128xf32>
    %c7 = arith.constant 7 : index
    %c0_45 = arith.constant 0 : index
    %c0_46 = arith.constant 0 : index
    %213 = vector.load %arg0[%c7, %c0_45, %c0_46] : memref<8x4x512xf32, #tpu.memory_space<vmem>>, vector<1x4x512xf32>
    %214 = vector.shape_cast %213 : vector<1x4x512xf32> to vector<4x512xf32>
    %215 = arith.truncf %212 : vector<4x128xf32> to vector<4x128xbf16>
    %cst_47 = arith.constant dense<0.000000e+00> : vector<4x512xf32>
    %216 = tpu.matmul %215, %0, %cst_47 {dimension_numbers = #tpu.dot_dimension_numbers<[1], [0], [0], [1], [0, 0, 1, 1], [], []>} : vector<4x128xbf16>, vector<128x512xbf16>, vector<4x512xf32> -> vector<4x512xf32>
    %217 = arith.addf %214, %216 : vector<4x512xf32>
    %218 = vector.extract_strided_slice %217 {offsets = [0, 0], sizes = [4, 128], strides = [1, 1]} : vector<4x512xf32> to vector<4x128xf32>
    %219 = arith.negf %218 : vector<4x128xf32>
    %220 = math.exp %219 : vector<4x128xf32>
    %cst_48 = arith.constant 1.000000e+00 : f32
    %221 = vector.broadcast %cst_48 : f32 to vector<4x128xf32>
    %222 = arith.addf %221, %220 : vector<4x128xf32>
    %223 = arith.divf %221, %222 : vector<4x128xf32>
    %224 = vector.extract_strided_slice %217 {offsets = [0, 128], sizes = [4, 128], strides = [1, 1]} : vector<4x512xf32> to vector<4x128xf32>
    %225 = arith.negf %224 : vector<4x128xf32>
    %226 = math.exp %225 : vector<4x128xf32>
    %cst_49 = arith.constant 1.000000e+00 : f32
    %227 = vector.broadcast %cst_49 : f32 to vector<4x128xf32>
    %228 = arith.addf %227, %226 : vector<4x128xf32>
    %229 = arith.divf %227, %228 : vector<4x128xf32>
    %230 = vector.extract_strided_slice %217 {offsets = [0, 256], sizes = [4, 128], strides = [1, 1]} : vector<4x512xf32> to vector<4x128xf32>
    %231 = math.tanh %230 : vector<4x128xf32>
    %232 = vector.extract_strided_slice %217 {offsets = [0, 384], sizes = [4, 128], strides = [1, 1]} : vector<4x512xf32> to vector<4x128xf32>
    %233 = arith.negf %232 : vector<4x128xf32>
    %234 = math.exp %233 : vector<4x128xf32>
    %cst_50 = arith.constant 1.000000e+00 : f32
    %235 = vector.broadcast %cst_50 : f32 to vector<4x128xf32>
    %236 = arith.addf %235, %234 : vector<4x128xf32>
    %237 = arith.divf %235, %236 : vector<4x128xf32>
    %238 = arith.mulf %229, %210 : vector<4x128xf32>
    %239 = arith.mulf %223, %231 : vector<4x128xf32>
    %240 = arith.addf %238, %239 : vector<4x128xf32>
    %241 = math.tanh %240 : vector<4x128xf32>
    %242 = arith.mulf %237, %241 : vector<4x128xf32>
    %c0_51 = arith.constant 0 : index
    %c0_52 = arith.constant 0 : index
    %243 = vector.load %arg2[%c0_51, %c0_52] : memref<128x12xf32, #tpu.memory_space<vmem>>, vector<128x12xf32>
    %cst_53 = arith.constant dense<0.000000e+00> : vector<4x12xf32>
    %244 = tpu.matmul %242, %243, %cst_53 {dimension_numbers = #tpu.dot_dimension_numbers<[1], [0], [0], [1], [0, 0, 1, 1], [], []>} : vector<4x128xf32>, vector<128x12xf32>, vector<4x12xf32> -> vector<4x12xf32>
    %c0_54 = arith.constant 0 : index
    %c0_55 = arith.constant 0 : index
    %245 = vector.load %arg3[%c0_54, %c0_55] : memref<1x12xf32, #tpu.memory_space<vmem>>, vector<1x12xf32>
    %246 = vector.broadcast %245 : vector<1x12xf32> to vector<4x12xf32>
    %247 = arith.addf %244, %246 : vector<4x12xf32>
    %c0_56 = arith.constant 0 : index
    %c0_57 = arith.constant 0 : index
    %248 = vector.load %arg4[%c0_56, %c0_57] : memref<4x12xf32, #tpu.memory_space<vmem>>, vector<4x12xf32>
    tpu.vector_store %arg4[%c0_56, %c0_57], %247 {strides = array<i32>} : memref<4x12xf32, #tpu.memory_space<vmem>>, vector<4x12xf32>,
    return
  }
}

</mosaic_0001>

<bundles_post_ra>
// kernel: net_forward.1
= control target key start
LH: loop header
LB: loop body
LE: loop exit
PB: predicated region body
PF: predicated region fallthrough
CT: control target
= control target key end

     0   :  { %v1709_v2 = vmov 0   ;;  %s2374_s0 = inlined_call_operand.vmem [shape: f32[8,4,512], index: 0, kind: input, shape index: {}]   ;;  %s2375_s1 = inlined_call_operand.vmem [shape: bf16[128,512], index: 1, kind: input, shape index: {}]   ;;  %s2376_s2 = inlined_call_operand.vmem [shape: f32[128,12], index: 2, kind: input, shape index: {}]   ;;  %s2377_s3 = inlined_call_operand.vmem [shape: f32[1,12], index: 3, kind: input, shape index: {}]   ;;  %s2378_s4 = inlined_call_operand.hbm [shape: f32[4,12], index: 4, kind: output, shape index: {}]  }
   0x1   :  { %v1742_v0 = vld [vmem:[%s2375_s1 + $0x4] ss:$16 sps:$4 sm:$0xff]   ;;  %v1747_v1 = vld [vmem:[%s2375_s1] ss:$16 sps:$4 sm:$0xff]   ;;  %245 = vmatprep.mubr.bf16.mxu0 %v1709_v2  ;;  %286 = vmatprep.mubr.bf16.mxu1 %v1709_v2  ;;  %v1772_v6 = vld [vmem:[%s2375_s1 + $0xc] ss:$16 sps:$4 sm:$0xff]  }
   0x2   :  { %213 = vmatprep.subr.bf16.mxu0 %v1742_v0  ;;  %v1755_v3 = vld [vmem:[%s2375_s1 + $0x24] ss:$16 sps:$4 sm:$0xff]   ;;  %v1761_v4 = vld [vmem:[%s2375_s1 + $0x20] ss:$16 sps:$4 sm:$0xff]   ;;  %v1777_v7 = vld [vmem:[%s2375_s1 + $0x8] ss:$16 sps:$4 sm:$0xff]   ;;  %254 = vmatprep.subr.bf16.mxu1 %v1772_v6 }
   0x3   :  { %214 = vmatpush1.bf16.msra.mxu0 %v1747_v1  ;;  %v1767_v5 = vld [vmem:[%s2375_s1 + $0x44] ss:$16 sps:$4 sm:$0xff]   ;;  %v1783_v8 = vld [vmem:[%s2375_s1 + $0x40] ss:$16 sps:$4 sm:$0xff]   ;;  %255 = vmatpush1.bf16.msra.mxu1 %v1777_v7  ;;  %v1796_v10 = vld [vmem:[%s2375_s1 + $0x2c] ss:$16 sps:$4 sm:$0xff]  }
   0x4   :  { %215 = vmatprep.subr.bf16.mxu0 %v1755_v3  ;;  %v1790_v9 = vld [vmem:[%s2375_s1 + $0x64] ss:$16 sps:$4 sm:$0xff]   ;;  %v1801_v11 = vld [vmem:[%s2375_s1 + $0x28] ss:$16 sps:$4 sm:$0xff]   ;;  %256 = vmatprep.subr.bf16.mxu1 %v1796_v10  ;;  %v1808_v12 = vld [vmem:[%s2375_s1 + $0x60] ss:$16 sps:$4 sm:$0xff]  }
   0x5   :  { %v1813_v13 = vld [vmem:[%s2375_s1 + $0x84] ss:$16 sps:$4 sm:$0xff]   ;;  %v1818_v14 = vld [vmem:[%s2375_s1 + $0x4c] ss:$16 sps:$4 sm:$0xff]   ;;  %v1825_v15 = vld [vmem:[%s2375_s1 + $0x48] ss:$16 sps:$4 sm:$0xff]  }
   0x6   :  { %v1831_v16 = vld [vmem:[%s2375_s1 + $0x6c] ss:$16 sps:$4 sm:$0xff]   ;;  %v1837_v17 = vld [vmem:[%s2375_s1 + $0x80] ss:$16 sps:$4 sm:$0xff]   ;;  %v1843_v18 = vld [vmem:[%s2375_s1 + $0xa4] ss:$16 sps:$4 sm:$0xff]  }
   0x7   :  { %216 = vmatpush1.bf16.msra.mxu0 %v1761_v4  ;;  %257 = vmatpush1.bf16.msra.mxu1 %v1801_v11  ;;  %v1849_v19 = vld [vmem:[%s2375_s1 + $0x68] ss:$16 sps:$4 sm:$0xff]   ;;  %v1855_v20 = vld [vmem:[%s2375_s1 + $0x8c] ss:$16 sps:$4 sm:$0xff]   ;;  %v1861_v21 = vld [vmem:[%s2375_s1 + $0xa0] ss:$16 sps:$4 sm:$0xff]  }
   0x8   :  { %217 = vmatprep.subr.bf16.mxu0 %v1767_v5  ;;  %258 = vmatprep.subr.bf16.mxu1 %v1818_v14  ;;  %v1866_v22 = vld [vmem:[%s2375_s1 + $0xc4] ss:$16 sps:$4 sm:$0xff]   ;;  %v1873_v23 = vld [vmem:[%s2375_s1 + $0x88] ss:$16 sps:$4 sm:$0xff]   ;;  %v1879_v24 = vld [vmem:[%s2375_s1 + $0xac] ss:$16 sps:$4 sm:$0xff]  }
   0xb   :  { %218 = vmatpush1.bf16.msra.mxu0 %v1783_v8  ;;  %259 = vmatpush1.bf16.msra.mxu1 %v1825_v15 }
   0xc   :  { %219 = vmatprep.subr.bf16.mxu0 %v1790_v9  ;;  %260 = vmatprep.subr.bf16.mxu1 %v1831_v16 }
   0xf   :  { %220 = vmatpush1.bf16.msra.mxu0 %v1808_v12  ;;  %261 = vmatpush1.bf16.msra.mxu1 %v1849_v19 }
  0x10   :  { %221 = vmatprep.subr.bf16.mxu0 %v1813_v13  ;;  %262 = vmatprep.subr.bf16.mxu1 %v1855_v20 }
  0x13   :  { %222 = vmatpush1.bf16.msra.mxu0 %v1837_v17 }
  0x14   :  { %223 = vmatprep.subr.bf16.mxu0 %v1843_v18 }
  0x15   :  { %9 = vsyncpa [#allocation3], 0  ;;  %v1885_v25 = vld [vmem:[%s2375_s1 + $0xc0] ss:$16 sps:$4 sm:$0xff]   ;;  %v1891_v26 = vld [vmem:[%s2375_s1 + $0xe4] ss:$16 sps:$4 sm:$0xff]   ;;  %263 = vmatpush1.bf16.msra.mxu1 %v1873_v23 }
  0x16   :  { %v1897_v27 = vld [vmem:[%s2375_s1 + $0xa8] ss:$16 sps:$4 sm:$0xff]   ;;  %264 = vmatprep.subr.bf16.mxu1 %v1879_v24  ;;  %v1903_v28 = vld [vmem:[%s2375_s1 + $0xcc] ss:$16 sps:$4 sm:$0xff]   ;;  %v1909_v29 = vld [vmem:[%s2375_s1 + $0xe0] ss:$16 sps:$4 sm:$0xff]  }
  0x17   :  { %224 = vmatpush1.bf16.msra.mxu0 %v1861_v21  ;;  %v1916_v30 = vld [vmem:[%s2375_s1 + $0xc8] ss:$16 sps:$4 sm:$0xff]   ;;  %v1922_v31 = vld [vmem:[%s2375_s1 + $0xec] ss:$16 sps:$4 sm:$0xff]   ;;  %v51_v34 = vld [vmem:[%s2374_s0] sm:$0xff]  ;;  %vm1711_vm0 = vmmov 0  }
  0x18   :  { %225 = vmatprep.subr.bf16.mxu0 %v1866_v22  ;;  %v1929_v32 = vld [vmem:[%s2375_s1 + $0xe8] ss:$16 sps:$4 sm:$0xff]   ;;  %s1713_s21 = smov [#allocation2]   ;;  %vm1310_vm1 = vcmask 93184  }
  0x19   :  { %265 = vmatpush1.bf16.msra.mxu1 %v1897_v27  ;;  %v52_v43 = vld [vmem:[%s2374_s0 + $0x8] sm:$0xff]  ;;  %s1318_s22 = sshll.u32 %s1713_s21, 4  ;;  %s1319_s22 = int_to_ptr.vmem [resolvable:$true] %s1318_s22 }
  0x1a   :  { %266 = vmatprep.subr.bf16.mxu1 %v1903_v28  ;;  %s1685_s23 = scalar_lea.vmem %s1319_s22, 64  ;;  %p1690_p1 = scmp.lt.s32.totalorder %s1319_s22, %s1319_s22 }
  0x1b   :  { %226 = vmatpush1.bf16.msra.mxu0 %v1885_v25  ;;  %p1686_p0 = scmp.ne.s32.totalorder %s1319_s22, %s1685_s23  ;;  %p1691_p2 = scmp.lt.s32.totalorder %s1685_s23, %s1685_s23 }
  0x1c   :  { %227 = vmatprep.subr.bf16.mxu0 %v1891_v26 }
  0x1d   :  { %267 = vmatpush1.bf16.msra.mxu1 %v1916_v30  ;;  %p1692_p3 = por %p1691_p2, %p1690_p1 }
  0x1e   :  { %268 = vmatprep.subr.bf16.mxu1 %v1922_v31 }
  0x1f   :  { %228 = vmatpush1.bf16.msra.mxu0 %v1909_v29  ;;  %p1693_p4 = pnand %p1692_p3, %p1686_p0 }
  0x20   :  { %339 = vmatprep.subr.bf16.mxu0 %v1742_v0 }
  0x21   :  { %269 = vmatpush1.bf16.msra.mxu1 %v1929_v32 }
  0x22   :  { %246 = vmatmul.mubr.bf16.vlgmr.msra.gmra.mrb[0].mxu0 %v1709_v2  ;;  %380 = vmatprep.subr.bf16.mxu1 %v1772_v6 }
  0x23   :  { %340 = vmatpush1.bf16.msra.mxu0 %v1747_v1  ;;  %371 = vmatprep.mubr.bf16.mxu0 %v1709_v2 }
  0x24   :  { %341 = vmatprep.subr.bf16.mxu0 %v1755_v3  ;;  %287 = vmatmul.mubr.bf16.vlgmr.msra.gmra.mrb[0].mxu1 %v1709_v2 }
  0x25   :  { %381 = vmatpush1.bf16.msra.mxu1 %v1777_v7  ;;  %412 = vmatprep.mubr.bf16.mxu1 %v1709_v2 }
  0x26   :  { %382 = vmatprep.subr.bf16.mxu1 %v1796_v10 }
  0x27   :  { %342 = vmatpush1.bf16.msra.mxu0 %v1761_v4 }
  0x28   :  { %343 = vmatprep.subr.bf16.mxu0 %v1767_v5 }
  0x29   :  { %383 = vmatpush1.bf16.msra.mxu1 %v1801_v11 }
  0x2a   :  { %384 = vmatprep.subr.bf16.mxu1 %v1818_v14 }
  0x2b   :  { %344 = vmatpush1.bf16.msra.mxu0 %v1783_v8 }
  0x2c   :  { %345 = vmatprep.subr.bf16.mxu0 %v1790_v9 }
  0x2d   :  { %385 = vmatpush1.bf16.msra.mxu1 %v1825_v15 }
  0x2e   :  { %386 = vmatprep.subr.bf16.mxu1 %v1831_v16 }
  0x2f   :  { %346 = vmatpush1.bf16.msra.mxu0 %v1808_v12 }
  0x30   :  { %347 = vmatprep.subr.bf16.mxu0 %v1813_v13 }
  0x31   :  { %387 = vmatpush1.bf16.msra.mxu1 %v1849_v19 }
  0x32   :  { %388 = vmatprep.subr.bf16.mxu1 %v1855_v20 }
  0x33   :  { %348 = vmatpush1.bf16.msra.mxu0 %v1837_v17 }
  0x34   :  { %349 = vmatprep.subr.bf16.mxu0 %v1843_v18 }
  0x35   :  { %389 = vmatpush1.bf16.msra.mxu1 %v1873_v23 }
  0x36   :  { %390 = vmatprep.subr.bf16.mxu1 %v1879_v24 }
  0x37   :  { %350 = vmatpush1.bf16.msra.mxu0 %v1861_v21 }
  0x38   :  { %351 = vmatprep.subr.bf16.mxu0 %v1866_v22 }
  0x39   :  { %391 = vmatpush1.bf16.msra.mxu1 %v1897_v27 }
  0x3a   :  { %392 = vmatprep.subr.bf16.mxu1 %v1903_v28 }
  0x3b   :  { %352 = vmatpush1.bf16.msra.mxu0 %v1885_v25 }
  0x3c   :  { %353 = vmatprep.subr.bf16.mxu0 %v1891_v26 }
  0x3d   :  { %393 = vmatpush1.bf16.msra.mxu1 %v1916_v30 }
  0x3e   :  { %394 = vmatprep.subr.bf16.mxu1 %v1922_v31 }
  0x3f   :  { %354 = vmatpush1.bf16.msra.mxu0 %v1909_v29 }
  0x40   :  { %465 = vmatprep.subr.bf16.mxu0 %v1742_v0 }
  0x41   :  { %395 = vmatpush1.bf16.msra.mxu1 %v1929_v32 }
  0x42   :  { %506 = vmatprep.subr.bf16.mxu1 %v1772_v6 }
  0xf5   :  { %v247_v33 = vpop.f32.mrb[0].mxu0 }
  0xf6   :  { %v249_v35 = vpop.f32.mrb[1].mxu0 }
  0xf7   :  { %v299_v36 = vcombine.low %v247_v33, %v249_v35  ;;  %v251_v37 = vpop.f32.mrb[2].mxu0  ;;  %v288_v40 = vpop.f32.mrb[0].mxu1 }
  0xf8   :  { %v252_v38 = vpop.f32.mrb[3].mxu0  ;;  %v290_v44 = vpop.f32.mrb[1].mxu1 }
  0xf9   :  { %v303_v39 = vadd.f32 %v299_v36, %v51_v34  ;;  %v300_v45 = vcombine.low %v288_v40, %v290_v44  ;;  %v292_v46 = vpop.f32.mrb[2].mxu1 }
  0xfa   :  { %v293_v48 = vpop.f32.mrb[3].mxu1 }
  0xfb   :  { %v1358_v41 = vmul.f32 -1.442695, %v303_v39  ;;  %v312_v42 = vrot.slane %v303_v39, 4  ;;  %v304_v49 = vadd.f32 %v300_v45, %v52_v43  ;;  %v1361_v39 = vld [vmem:[%s2374_s0 + $0x10] sm:$0xff] }
  0xfd   :  { %1526 = vpow2.f32 %v1358_v41  ;;  %v1359_v47 = vmul.f32 -1.442695, %v312_v42  ;;  %v322_v50 = vrot.slane %v304_v49, 4 }
  0xff   :  { %1528 = vpow2.f32 %v1359_v47  ;;  %v1360_v51 = vmul.f32 -1.442695, %v322_v50 }
 0x100   :  { %1530 = vtanh.f32 %v304_v49  ;;  %v1362_v49 = vld [vmem:[%s2374_s0 + $0x18] sm:$0xff] }
 0x101   :  { %1532 = vpow2.f32 %v1360_v51 }
 0x107   :  { %v1527_v52 = vpop.eup %1526 }
 0x108   :  { %v308_v53 = vadd.f32 1.0, %v1527_v52 }
 0x109   :  { %v1529_v54 = vpop.eup %1528 }
 0x10a   :  { %1534 = vrcp.f32 %v308_v53  ;;  %v317_v55 = vadd.f32 1.0, %v1529_v54  ;;  %v1531_v56 = vpop.eup %1530 }
 0x10b   :  { %v1533_v57 = vpop.eup %1532 }
 0x10c   :  { %1536 = vrcp.f32 %v317_v55  ;;  %v327_v59 = vadd.f32 1.0, %v1533_v57 }
 0x10e   :  { %1538 = vrcp.f32 %v327_v59 }
 0x114   :  { %v1535_v58 = vpop.eup %1534 }
 0x115   :  { %v331_v60 = vmul.f32 %v1535_v58, %v1531_v56 }
 0x116   :  { %v1537_v61 = vpop.eup %1536 }
 0x117   :  { %v330_v62 = vmul.f32 0.0, %v1537_v61 }
 0x118   :  { %v1539_v33 = vpop.eup %1538 }
 0x119   :  { %v1977_v63 = vadd.f32 %v331_v60, %v330_v62 }
 0x11b   :  { %1540 = vtanh.f32 %v1977_v63 }
 0x125   :  { %v1541_v34 = vpop.eup %1540 }
 0x126   :  { %v334_v35 = vmul.f32 %v1541_v34, %v1539_v33 }
 0x128   :  { %v338_v36 = vpack.c.bf16 %v334_v35, %v334_v35 }
 0x12a   :  { %372 = vmatmul.mubr.bf16.vlgmr.msra.gmra.mrb[4].mxu0 %v338_v36  ;;  %413 = vmatmul.mubr.bf16.vlgmr.msra.gmra.mrb[4].mxu1 %v338_v36 }
 0x12b   :  { %466 = vmatpush1.bf16.msra.mxu0 %v1747_v1  ;;  %507 = vmatpush1.bf16.msra.mxu1 %v1777_v7 }
 0x12c   :  { %467 = vmatprep.subr.bf16.mxu0 %v1755_v3  ;;  %508 = vmatprep.subr.bf16.mxu1 %v1796_v10 }
 0x12d   :  { %497 = vmatprep.mubr.bf16.mxu0 %v1709_v2  ;;  %538 = vmatprep.mubr.bf16.mxu1 %v1709_v2 }
 0x12f   :  { %468 = vmatpush1.bf16.msra.mxu0 %v1761_v4  ;;  %509 = vmatpush1.bf16.msra.mxu1 %v1801_v11 }
 0x130   :  { %469 = vmatprep.subr.bf16.mxu0 %v1767_v5  ;;  %510 = vmatprep.subr.bf16.mxu1 %v1818_v14 }
 0x133   :  { %470 = vmatpush1.bf16.msra.mxu0 %v1783_v8  ;;  %511 = vmatpush1.bf16.msra.mxu1 %v1825_v15 }
 0x134   :  { %471 = vmatprep.subr.bf16.mxu0 %v1790_v9  ;;  %512 = vmatprep.subr.bf16.mxu1 %v1831_v16 }
 0x137   :  { %472 = vmatpush1.bf16.msra.mxu0 %v1808_v12  ;;  %513 = vmatpush1.bf16.msra.mxu1 %v1849_v19 }
 0x138   :  { %473 = vmatprep.subr.bf16.mxu0 %v1813_v13  ;;  %514 = vmatprep.subr.bf16.mxu1 %v1855_v20 }
 0x13b   :  { %474 = vmatpush1.bf16.msra.mxu0 %v1837_v17  ;;  %515 = vmatpush1.bf16.msra.mxu1 %v1873_v23 }
 0x13c   :  { %475 = vmatprep.subr.bf16.mxu0 %v1843_v18  ;;  %516 = vmatprep.subr.bf16.mxu1 %v1879_v24 }
 0x13f   :  { %476 = vmatpush1.bf16.msra.mxu0 %v1861_v21  ;;  %517 = vmatpush1.bf16.msra.mxu1 %v1897_v27 }
 0x140   :  { %477 = vmatprep.subr.bf16.mxu0 %v1866_v22  ;;  %518 = vmatprep.subr.bf16.mxu1 %v1903_v28 }
 0x143   :  { %478 = vmatpush1.bf16.msra.mxu0 %v1885_v25  ;;  %519 = vmatpush1.bf16.msra.mxu1 %v1916_v30 }
 0x144   :  { %479 = vmatprep.subr.bf16.mxu0 %v1891_v26  ;;  %520 = vmatprep.subr.bf16.mxu1 %v1922_v31 }
 0x147   :  { %480 = vmatpush1.bf16.msra.mxu0 %v1909_v29  ;;  %521 = vmatpush1.bf16.msra.mxu1 %v1929_v32 }
 0x148   :  { %591 = vmatprep.subr.bf16.mxu0 %v1742_v0  ;;  %632 = vmatprep.subr.bf16.mxu1 %v1772_v6 }
 0x1fd   :  { %v373_v37 = vpop.f32.mrb[4].mxu0  ;;  %v414_v38 = vpop.f32.mrb[4].mxu1 }
 0x1fe   :  { %v375_v40 = vpop.f32.mrb[5].mxu0  ;;  %v416_v41 = vpop.f32.mrb[5].mxu1 }
 0x1ff   :  { %v425_v42 = vcombine.low %v373_v37, %v375_v40  ;;  %v426_v43 = vcombine.low %v414_v38, %v416_v41  ;;  %v377_v44 = vpop.f32.mrb[6].mxu0  ;;  %v418_v45 = vpop.f32.mrb[6].mxu1 }
 0x200   :  { %v378_v46 = vpop.f32.mrb[7].mxu0  ;;  %v419_v47 = vpop.f32.mrb[7].mxu1 }
 0x201   :  { %v429_v48 = vadd.f32 %v1361_v39, %v425_v42  ;;  %v430_v53 = vadd.f32 %v1362_v49, %v426_v43  ;;  %v1366_v43 = vld [vmem:[%s2374_s0 + $0x20] sm:$0xff] }
 0x203   :  { %v1363_v50 = vmul.f32 -1.442695, %v429_v48  ;;  %v438_v51 = vrot.slane %v429_v48, 4  ;;  %v448_v54 = vrot.slane %v430_v53, 4 }
 0x205   :  { %1542 = vpow2.f32 %v1363_v50  ;;  %v1364_v52 = vmul.f32 -1.442695, %v438_v51  ;;  %v1365_v55 = vmul.f32 -1.442695, %v448_v54 }
 0x207   :  { %1544 = vpow2.f32 %v1364_v52 }
 0x208   :  { %1546 = vtanh.f32 %v430_v53  ;;  %v1367_v53 = vld [vmem:[%s2374_s0 + $0x28] sm:$0xff] }
 0x209   :  { %1548 = vpow2.f32 %v1365_v55 }
 0x20f   :  { %v1543_v56 = vpop.eup %1542 }
 0x210   :  { %v434_v57 = vadd.f32 1.0, %v1543_v56 }
 0x211   :  { %v1545_v58 = vpop.eup %1544 }
 0x212   :  { %1550 = vrcp.f32 %v434_v57  ;;  %v443_v59 = vadd.f32 1.0, %v1545_v58  ;;  %v1547_v60 = vpop.eup %1546 }
 0x213   :  { %v1549_v61 = vpop.eup %1548 }
 0x214   :  { %1552 = vrcp.f32 %v443_v59  ;;  %v453_v35 = vadd.f32 1.0, %v1549_v61 }
 0x216   :  { %1554 = vrcp.f32 %v453_v35 }
 0x21c   :  { %v1551_v62 = vpop.eup %1550 }
 0x21d   :  { %v457_v33 = vmul.f32 %v1551_v62, %v1547_v60 }
 0x21e   :  { %v1553_v34 = vpop.eup %1552 }
 0x21f   :  { %v456_v36 = vmul.f32 %v1553_v34, %v1977_v63 }
 0x220   :  { %v1555_v38 = vpop.eup %1554 }
 0x221   :  { %v2021_v37 = vadd.f32 %v457_v33, %v456_v36 }
 0x223   :  { %1556 = vtanh.f32 %v2021_v37 }
 0x22d   :  { %v1557_v39 = vpop.eup %1556 }
 0x22e   :  { %v460_v40 = vmul.f32 %v1557_v39, %v1555_v38 }
 0x230   :  { %v464_v41 = vpack.c.bf16 %v460_v40, %v460_v40 }
 0x232   :  { %498 = vmatmul.mubr.bf16.vlgmr.msra.gmra.mrb[8].mxu0 %v464_v41  ;;  %539 = vmatmul.mubr.bf16.vlgmr.msra.gmra.mrb[8].mxu1 %v464_v41 }
 0x233   :  { %592 = vmatpush1.bf16.msra.mxu0 %v1747_v1  ;;  %633 = vmatpush1.bf16.msra.mxu1 %v1777_v7 }
 0x234   :  { %593 = vmatprep.subr.bf16.mxu0 %v1755_v3  ;;  %634 = vmatprep.subr.bf16.mxu1 %v1796_v10 }
 0x235   :  { %623 = vmatprep.mubr.bf16.mxu0 %v1709_v2  ;;  %664 = vmatprep.mubr.bf16.mxu1 %v1709_v2 }
 0x237   :  { %594 = vmatpush1.bf16.msra.mxu0 %v1761_v4  ;;  %635 = vmatpush1.bf16.msra.mxu1 %v1801_v11 }
 0x238   :  { %595 = vmatprep.subr.bf16.mxu0 %v1767_v5  ;;  %636 = vmatprep.subr.bf16.mxu1 %v1818_v14 }
 0x23b   :  { %596 = vmatpush1.bf16.msra.mxu0 %v1783_v8  ;;  %637 = vmatpush1.bf16.msra.mxu1 %v1825_v15 }
 0x23c   :  { %597 = vmatprep.subr.bf16.mxu0 %v1790_v9  ;;  %638 = vmatprep.subr.bf16.mxu1 %v1831_v16 }
 0x23f   :  { %598 = vmatpush1.bf16.msra.mxu0 %v1808_v12  ;;  %639 = vmatpush1.bf16.msra.mxu1 %v1849_v19 }
 0x240   :  { %599 = vmatprep.subr.bf16.mxu0 %v1813_v13  ;;  %640 = vmatprep.subr.bf16.mxu1 %v1855_v20 }
 0x243   :  { %600 = vmatpush1.bf16.msra.mxu0 %v1837_v17  ;;  %641 = vmatpush1.bf16.msra.mxu1 %v1873_v23 }
 0x244   :  { %601 = vmatprep.subr.bf16.mxu0 %v1843_v18  ;;  %642 = vmatprep.subr.bf16.mxu1 %v1879_v24 }
 0x247   :  { %602 = vmatpush1.bf16.msra.mxu0 %v1861_v21  ;;  %643 = vmatpush1.bf16.msra.mxu1 %v1897_v27 }
 0x248   :  { %603 = vmatprep.subr.bf16.mxu0 %v1866_v22  ;;  %644 = vmatprep.subr.bf16.mxu1 %v1903_v28 }
 0x24b   :  { %604 = vmatpush1.bf16.msra.mxu0 %v1885_v25  ;;  %645 = vmatpush1.bf16.msra.mxu1 %v1916_v30 }
 0x24c   :  { %605 = vmatprep.subr.bf16.mxu0 %v1891_v26  ;;  %646 = vmatprep.subr.bf16.mxu1 %v1922_v31 }
 0x24f   :  { %606 = vmatpush1.bf16.msra.mxu0 %v1909_v29  ;;  %647 = vmatpush1.bf16.msra.mxu1 %v1929_v32 }
 0x250   :  { %717 = vmatprep.subr.bf16.mxu0 %v1742_v0  ;;  %758 = vmatprep.subr.bf16.mxu1 %v1772_v6 }
 0x305   :  { %v499_v63 = vpop.f32.mrb[8].mxu0  ;;  %v540_v42 = vpop.f32.mrb[8].mxu1 }
 0x306   :  { %v501_v44 = vpop.f32.mrb[9].mxu0  ;;  %v542_v45 = vpop.f32.mrb[9].mxu1 }
 0x307   :  { %v551_v46 = vcombine.low %v499_v63, %v501_v44  ;;  %v552_v47 = vcombine.low %v540_v42, %v542_v45  ;;  %v503_v48 = vpop.f32.mrb[10].mxu0  ;;  %v544_v49 = vpop.f32.mrb[10].mxu1 }
 0x308   :  { %v504_v50 = vpop.f32.mrb[11].mxu0  ;;  %v545_v51 = vpop.f32.mrb[11].mxu1 }
 0x309   :  { %v555_v52 = vadd.f32 %v1366_v43, %v551_v46  ;;  %v556_v57 = vadd.f32 %v1367_v53, %v552_v47  ;;  %v1371_v47 = vld [vmem:[%s2374_s0 + $0x30] sm:$0xff] }
 0x30b   :  { %v1368_v54 = vmul.f32 -1.442695, %v555_v52  ;;  %v564_v55 = vrot.slane %v555_v52, 4  ;;  %v574_v58 = vrot.slane %v556_v57, 4 }
 0x30d   :  { %1558 = vpow2.f32 %v1368_v54  ;;  %v1369_v56 = vmul.f32 -1.442695, %v564_v55  ;;  %v1370_v59 = vmul.f32 -1.442695, %v574_v58 }
 0x30f   :  { %1560 = vpow2.f32 %v1369_v56 }
 0x310   :  { %1562 = vtanh.f32 %v556_v57  ;;  %v1372_v57 = vld [vmem:[%s2374_s0 + $0x38] sm:$0xff] }
 0x311   :  { %1564 = vpow2.f32 %v1370_v59 }
 0x317   :  { %v1559_v60 = vpop.eup %1558 }
 0x318   :  { %v560_v61 = vadd.f32 1.0, %v1559_v60 }
 0x319   :  { %v1561_v62 = vpop.eup %1560 }
 0x31a   :  { %1566 = vrcp.f32 %v560_v61  ;;  %v569_v33 = vadd.f32 1.0, %v1561_v62  ;;  %v1563_v34 = vpop.eup %1562 }
 0x31b   :  { %v1565_v35 = vpop.eup %1564 }
 0x31c   :  { %1568 = vrcp.f32 %v569_v33  ;;  %v579_v40 = vadd.f32 1.0, %v1565_v35 }
 0x31e   :  { %1570 = vrcp.f32 %v579_v40 }
 0x324   :  { %v1567_v36 = vpop.eup %1566 }
 0x325   :  { %v583_v38 = vmul.f32 %v1567_v36, %v1563_v34 }
 0x326   :  { %v1569_v39 = vpop.eup %1568 }
 0x327   :  { %v582_v41 = vmul.f32 %v1569_v39, %v2021_v37 }
 0x328   :  { %v1571_v42 = vpop.eup %1570 }
 0x329   :  { %v2065_v63 = vadd.f32 %v583_v38, %v582_v41 }
 0x32b   :  { %1572 = vtanh.f32 %v2065_v63 }
 0x335   :  { %v1573_v43 = vpop.eup %1572 }
 0x336   :  { %v586_v44 = vmul.f32 %v1573_v43, %v1571_v42 }
 0x338   :  { %v590_v45 = vpack.c.bf16 %v586_v44, %v586_v44 }
 0x33a   :  { %624 = vmatmul.mubr.bf16.vlgmr.msra.gmra.mrb[12].mxu0 %v590_v45  ;;  %665 = vmatmul.mubr.bf16.vlgmr.msra.gmra.mrb[12].mxu1 %v590_v45 }
 0x33b   :  { %718 = vmatpush1.bf16.msra.mxu0 %v1747_v1  ;;  %759 = vmatpush1.bf16.msra.mxu1 %v1777_v7 }
 0x33c   :  { %719 = vmatprep.subr.bf16.mxu0 %v1755_v3  ;;  %760 = vmatprep.subr.bf16.mxu1 %v1796_v10 }
 0x33d   :  { %749 = vmatprep.mubr.bf16.mxu0 %v1709_v2  ;;  %790 = vmatprep.mubr.bf16.mxu1 %v1709_v2 }
 0x33f   :  { %720 = vmatpush1.bf16.msra.mxu0 %v1761_v4  ;;  %761 = vmatpush1.bf16.msra.mxu1 %v1801_v11 }
 0x340   :  { %721 = vmatprep.subr.bf16.mxu0 %v1767_v5  ;;  %762 = vmatprep.subr.bf16.mxu1 %v1818_v14 }
 0x343   :  { %722 = vmatpush1.bf16.msra.mxu0 %v1783_v8  ;;  %763 = vmatpush1.bf16.msra.mxu1 %v1825_v15 }
 0x344   :  { %723 = vmatprep.subr.bf16.mxu0 %v1790_v9  ;;  %764 = vmatprep.subr.bf16.mxu1 %v1831_v16 }
 0x347   :  { %724 = vmatpush1.bf16.msra.mxu0 %v1808_v12  ;;  %765 = vmatpush1.bf16.msra.mxu1 %v1849_v19 }
 0x348   :  { %725 = vmatprep.subr.bf16.mxu0 %v1813_v13  ;;  %766 = vmatprep.subr.bf16.mxu1 %v1855_v20 }
 0x34b   :  { %726 = vmatpush1.bf16.msra.mxu0 %v1837_v17  ;;  %767 = vmatpush1.bf16.msra.mxu1 %v1873_v23 }
 0x34c   :  { %727 = vmatprep.subr.bf16.mxu0 %v1843_v18  ;;  %768 = vmatprep.subr.bf16.mxu1 %v1879_v24 }
 0x34f   :  { %728 = vmatpush1.bf16.msra.mxu0 %v1861_v21  ;;  %769 = vmatpush1.bf16.msra.mxu1 %v1897_v27 }
 0x350   :  { %729 = vmatprep.subr.bf16.mxu0 %v1866_v22  ;;  %770 = vmatprep.subr.bf16.mxu1 %v1903_v28 }
 0x353   :  { %730 = vmatpush1.bf16.msra.mxu0 %v1885_v25  ;;  %771 = vmatpush1.bf16.msra.mxu1 %v1916_v30 }
 0x354   :  { %731 = vmatprep.subr.bf16.mxu0 %v1891_v26  ;;  %772 = vmatprep.subr.bf16.mxu1 %v1922_v31 }
 0x357   :  { %732 = vmatpush1.bf16.msra.mxu0 %v1909_v29  ;;  %773 = vmatpush1.bf16.msra.mxu1 %v1929_v32 }
 0x358   :  { %843 = vmatprep.subr.bf16.mxu0 %v1742_v0  ;;  %884 = vmatprep.subr.bf16.mxu1 %v1772_v6 }
 0x40d   :  { %v625_v37 = vpop.f32.mrb[12].mxu0  ;;  %v666_v46 = vpop.f32.mrb[12].mxu1 }
 0x40e   :  { %v627_v48 = vpop.f32.mrb[13].mxu0  ;;  %v668_v49 = vpop.f32.mrb[13].mxu1 }
 0x40f   :  { %v677_v50 = vcombine.low %v625_v37, %v627_v48  ;;  %v678_v51 = vcombine.low %v666_v46, %v668_v49  ;;  %v629_v52 = vpop.f32.mrb[14].mxu0  ;;  %v670_v53 = vpop.f32.mrb[14].mxu1 }
 0x410   :  { %v630_v54 = vpop.f32.mrb[15].mxu0  ;;  %v671_v55 = vpop.f32.mrb[15].mxu1 }
 0x411   :  { %v681_v56 = vadd.f32 %v1371_v47, %v677_v50  ;;  %v682_v61 = vadd.f32 %v1372_v57, %v678_v51  ;;  %v1376_v51 = vld [vmem:[%s2374_s0 + $0x40] sm:$0xff] }
 0x413   :  { %v1373_v58 = vmul.f32 -1.442695, %v681_v56  ;;  %v690_v59 = vrot.slane %v681_v56, 4  ;;  %v700_v62 = vrot.slane %v682_v61, 4 }
 0x415   :  { %1574 = vpow2.f32 %v1373_v58  ;;  %v1374_v60 = vmul.f32 -1.442695, %v690_v59  ;;  %v1375_v33 = vmul.f32 -1.442695, %v700_v62 }
 0x417   :  { %1576 = vpow2.f32 %v1374_v60 }
 0x418   :  { %1578 = vtanh.f32 %v682_v61 }
 0x419   :  { %1580 = vpow2.f32 %v1375_v33 }
 0x41f   :  { %v1575_v34 = vpop.eup %1574 }
 0x420   :  { %v686_v35 = vadd.f32 1.0, %v1575_v34 }
 0x421   :  { %v1577_v36 = vpop.eup %1576 }
 0x422   :  { %1582 = vrcp.f32 %v686_v35  ;;  %v695_v38 = vadd.f32 1.0, %v1577_v36  ;;  %v1579_v39 = vpop.eup %1578 }
 0x423   :  { %v1581_v40 = vpop.eup %1580 }
 0x424   :  { %1584 = vrcp.f32 %v695_v38  ;;  %v705_v44 = vadd.f32 1.0, %v1581_v40 }
 0x426   :  { %1586 = vrcp.f32 %v705_v44 }
 0x42c   :  { %v1583_v41 = vpop.eup %1582 }
 0x42d   :  { %v709_v42 = vmul.f32 %v1583_v41, %v1579_v39 }
 0x42e   :  { %v1585_v43 = vpop.eup %1584 }
 0x42f   :  { %v708_v45 = vmul.f32 %v1585_v43, %v2065_v63 }
 0x430   :  { %v1587_v46 = vpop.eup %1586 }
 0x431   :  { %v2109_v37 = vadd.f32 %v709_v42, %v708_v45 }
 0x433   :  { %1588 = vtanh.f32 %v2109_v37 }
 0x43d   :  { %v1589_v47 = vpop.eup %1588 }
 0x43e   :  { %v712_v48 = vmul.f32 %v1589_v47, %v1587_v46 }
 0x440   :  { %v716_v49 = vpack.c.bf16 %v712_v48, %v712_v48 }
 0x442   :  { %750 = vmatmul.mubr.bf16.vlgmr.msra.gmra.mrb[16].mxu0 %v716_v49  ;;  %791 = vmatmul.mubr.bf16.vlgmr.msra.gmra.mrb[16].mxu1 %v716_v49 }
 0x443   :  { %844 = vmatpush1.bf16.msra.mxu0 %v1747_v1  ;;  %885 = vmatpush1.bf16.msra.mxu1 %v1777_v7 }
 0x444   :  { %845 = vmatprep.subr.bf16.mxu0 %v1755_v3  ;;  %886 = vmatprep.subr.bf16.mxu1 %v1796_v10 }
 0x445   :  { %875 = vmatprep.mubr.bf16.mxu0 %v1709_v2  ;;  %916 = vmatprep.mubr.bf16.mxu1 %v1709_v2 }
 0x447   :  { %846 = vmatpush1.bf16.msra.mxu0 %v1761_v4  ;;  %887 = vmatpush1.bf16.msra.mxu1 %v1801_v11 }
 0x448   :  { %847 = vmatprep.subr.bf16.mxu0 %v1767_v5  ;;  %888 = vmatprep.subr.bf16.mxu1 %v1818_v14 }
 0x44b   :  { %848 = vmatpush1.bf16.msra.mxu0 %v1783_v8  ;;  %889 = vmatpush1.bf16.msra.mxu1 %v1825_v15 }
 0x44c   :  { %849 = vmatprep.subr.bf16.mxu0 %v1790_v9  ;;  %890 = vmatprep.subr.bf16.mxu1 %v1831_v16 }
 0x44f   :  { %850 = vmatpush1.bf16.msra.mxu0 %v1808_v12  ;;  %891 = vmatpush1.bf16.msra.mxu1 %v1849_v19 }
 0x450   :  { %851 = vmatprep.subr.bf16.mxu0 %v1813_v13  ;;  %892 = vmatprep.subr.bf16.mxu1 %v1855_v20 }
 0x453   :  { %852 = vmatpush1.bf16.msra.mxu0 %v1837_v17  ;;  %893 = vmatpush1.bf16.msra.mxu1 %v1873_v23 }
 0x454   :  { %853 = vmatprep.subr.bf16.mxu0 %v1843_v18  ;;  %894 = vmatprep.subr.bf16.mxu1 %v1879_v24 }
 0x457   :  { %854 = vmatpush1.bf16.msra.mxu0 %v1861_v21  ;;  %895 = vmatpush1.bf16.msra.mxu1 %v1897_v27 }
 0x458   :  { %855 = vmatprep.subr.bf16.mxu0 %v1866_v22  ;;  %896 = vmatprep.subr.bf16.mxu1 %v1903_v28 }
 0x45b   :  { %856 = vmatpush1.bf16.msra.mxu0 %v1885_v25  ;;  %897 = vmatpush1.bf16.msra.mxu1 %v1916_v30 }
 0x45c   :  { %857 = vmatprep.subr.bf16.mxu0 %v1891_v26  ;;  %898 = vmatprep.subr.bf16.mxu1 %v1922_v31 }
 0x45f   :  { %858 = vmatpush1.bf16.msra.mxu0 %v1909_v29  ;;  %899 = vmatpush1.bf16.msra.mxu1 %v1929_v32 }
 0x460   :  { %969 = vmatprep.subr.bf16.mxu0 %v1742_v0  ;;  %1010 = vmatprep.subr.bf16.mxu1 %v1772_v6  ;;  %v1377_v0 = vld [vmem:[%s2374_s0 + $0x48] sm:$0xff] }
 0x515   :  { %v751_v63 = vpop.f32.mrb[16].mxu0  ;;  %v792_v50 = vpop.f32.mrb[16].mxu1 }
 0x516   :  { %v753_v52 = vpop.f32.mrb[17].mxu0  ;;  %v794_v53 = vpop.f32.mrb[17].mxu1 }
 0x517   :  { %v803_v54 = vcombine.low %v751_v63, %v753_v52  ;;  %v804_v55 = vcombine.low %v792_v50, %v794_v53  ;;  %v755_v56 = vpop.f32.mrb[18].mxu0  ;;  %v796_v57 = vpop.f32.mrb[18].mxu1 }
 0x518   :  { %v756_v58 = vpop.f32.mrb[19].mxu0  ;;  %v797_v59 = vpop.f32.mrb[19].mxu1  ;;  %v1655_v57 = vld [vmem:[%s2375_s1] ss:$16 sps:$4 sm:$0xff]  }
 0x519   :  { %v807_v60 = vadd.f32 %v1376_v51, %v803_v54  ;;  %v808_v34 = vadd.f32 %v1377_v0, %v804_v55  ;;  %v1656_v58 = vld [vmem:[%s2375_s1 + $0x8] ss:$16 sps:$4 sm:$0xff]   ;;  %v1657_v59 = vld [vmem:[%s2375_s1 + $0x24] ss:$16 sps:$4 sm:$0xff]   ;;  %v1659_v0 = vld [vmem:[%s2375_s1 + $0x20] ss:$16 sps:$4 sm:$0xff]  }
 0x51b   :  { %v1378_v61 = vmul.f32 -1.442695, %v807_v60  ;;  %v816_v62 = vrot.slane %v807_v60, 4  ;;  %v826_v35 = vrot.slane %v808_v34, 4  ;;  %v1658_v60 = vld [vmem:[%s2375_s1 + $0x2c] ss:$16 sps:$4 sm:$0xff]  }
 0x51d   :  { %1590 = vpow2.f32 %v1378_v61  ;;  %v1379_v33 = vmul.f32 -1.442695, %v816_v62  ;;  %v1380_v36 = vmul.f32 -1.442695, %v826_v35  ;;  %v1660_v61 = vld [vmem:[%s2375_s1 + $0x28] ss:$16 sps:$4 sm:$0xff]  }
 0x51e   :  { %v1661_v62 = vld [vmem:[%s2375_s1 + $0x44] ss:$16 sps:$4 sm:$0xff]  }
 0x51f   :  { %1592 = vpow2.f32 %v1379_v33  ;;  %v1662_v33 = vld [vmem:[%s2375_s1 + $0x4c] ss:$16 sps:$4 sm:$0xff]   ;;  %v1665_v35 = vld [vmem:[%s2375_s1 + $0x64] ss:$16 sps:$4 sm:$0xff]  }
 0x520   :  { %1594 = vtanh.f32 %v808_v34  ;;  %v1664_v34 = vld [vmem:[%s2375_s1 + $0x48] ss:$16 sps:$4 sm:$0xff]  }
 0x521   :  { %1596 = vpow2.f32 %v1380_v36  ;;  %v1666_v36 = vld [vmem:[%s2375_s1 + $0x6c] ss:$16 sps:$4 sm:$0xff]  }
 0x527   :  { %v1591_v38 = vpop.eup %1590 }
 0x528   :  { %v812_v39 = vadd.f32 1.0, %v1591_v38  ;;  %v1667_v38 = vld [vmem:[%s2375_s1 + $0x60] ss:$16 sps:$4 sm:$0xff]  }
 0x529   :  { %v1593_v40 = vpop.eup %1592 }
 0x52a   :  { %1598 = vrcp.f32 %v812_v39  ;;  %v821_v41 = vadd.f32 1.0, %v1593_v40  ;;  %v1595_v42 = vpop.eup %1594  ;;  %v1668_v39 = vld [vmem:[%s2375_s1 + $0x68] ss:$16 sps:$4 sm:$0xff]   ;;  %v1669_v40 = vld [vmem:[%s2375_s1 + $0x84] ss:$16 sps:$4 sm:$0xff]  }
 0x52b   :  { %v1597_v43 = vpop.eup %1596 }
 0x52c   :  { %1600 = vrcp.f32 %v821_v41  ;;  %v831_v47 = vadd.f32 1.0, %v1597_v43  ;;  %v1670_v41 = vld [vmem:[%s2375_s1 + $0x8c] ss:$16 sps:$4 sm:$0xff]   ;;  %v1672_v43 = vld [vmem:[%s2375_s1 + $0x88] ss:$16 sps:$4 sm:$0xff]  }
 0x52e   :  { %1602 = vrcp.f32 %v831_v47  ;;  %v1676_v47 = vld [vmem:[%s2375_s1 + $0xa8] ss:$16 sps:$4 sm:$0xff]  }
 0x534   :  { %v1599_v44 = vpop.eup %1598 }
 0x535   :  { %v835_v45 = vmul.f32 %v1599_v44, %v1595_v42  ;;  %v1671_v42 = vld [vmem:[%s2375_s1 + $0x80] ss:$16 sps:$4 sm:$0xff]   ;;  %v1673_v44 = vld [vmem:[%s2375_s1 + $0xa4] ss:$16 sps:$4 sm:$0xff]  }
 0x536   :  { %v1601_v46 = vpop.eup %1600 }
 0x537   :  { %v834_v48 = vmul.f32 %v1601_v46, %v2109_v37  ;;  %v1675_v46 = vld [vmem:[%s2375_s1 + $0xa0] ss:$16 sps:$4 sm:$0xff]  }
 0x538   :  { %v1603_v63 = vpop.eup %1602 }
 0x539   :  { %v2153_v49 = vadd.f32 %v835_v45, %v834_v48  ;;  %v1674_v45 = vld [vmem:[%s2375_s1 + $0xac] ss:$16 sps:$4 sm:$0xff]   ;;  %v1677_v48 = vld [vmem:[%s2375_s1 + $0xc4] ss:$16 sps:$4 sm:$0xff]  }
 0x53b   :  { %1604 = vtanh.f32 %v2153_v49 }
 0x545   :  { %v1605_v50 = vpop.eup %1604 }
 0x546   :  { %v838_v51 = vmul.f32 %v1605_v50, %v1603_v63  ;;  %v1679_v63 = vld [vmem:[%s2375_s1 + $0xc0] ss:$16 sps:$4 sm:$0xff]   ;;  %v1680_v50 = vld [vmem:[%s2375_s1 + $0xc8] ss:$16 sps:$4 sm:$0xff]  }
 0x548   :  { %v842_v52 = vpack.c.bf16 %v838_v51, %v838_v51  ;;  %v1681_v51 = vld [vmem:[%s2375_s1 + $0xe4] ss:$16 sps:$4 sm:$0xff]  }
 0x54a   :  { %876 = vmatmul.mubr.bf16.vlgmr.msra.gmra.mrb[20].mxu0 %v842_v52  ;;  %917 = vmatmul.mubr.bf16.vlgmr.msra.gmra.mrb[20].mxu1 %v842_v52  ;;  %v1682_v52 = vld [vmem:[%s2375_s1 + $0xec] ss:$16 sps:$4 sm:$0xff]  }
 0x54b   :  { %970 = vmatpush1.bf16.msra.mxu0 %v1747_v1  ;;  %1011 = vmatpush1.bf16.msra.mxu1 %v1777_v7  ;;  %v1654_v1 = vld [vmem:[%s2375_s1 + $0x4] ss:$16 sps:$4 sm:$0xff]  }
 0x54c   :  { %971 = vmatprep.subr.bf16.mxu0 %v1755_v3  ;;  %1012 = vmatprep.subr.bf16.mxu1 %v1796_v10 }
 0x54d   :  { %1001 = vmatprep.mubr.bf16.mxu0 %v1709_v2  ;;  %1042 = vmatprep.mubr.bf16.mxu1 %v1709_v2 }
 0x54f   :  { %972 = vmatpush1.bf16.msra.mxu0 %v1761_v4  ;;  %1013 = vmatpush1.bf16.msra.mxu1 %v1801_v11 }
 0x550   :  { %973 = vmatprep.subr.bf16.mxu0 %v1767_v5  ;;  %1014 = vmatprep.subr.bf16.mxu1 %v1818_v14  ;;  %v1381_v5 = vld [vmem:[%s2374_s0 + $0x50] sm:$0xff] }
 0x553   :  { %974 = vmatpush1.bf16.msra.mxu0 %v1783_v8  ;;  %1015 = vmatpush1.bf16.msra.mxu1 %v1825_v15 }
 0x554   :  { %975 = vmatprep.subr.bf16.mxu0 %v1790_v9  ;;  %1016 = vmatprep.subr.bf16.mxu1 %v1831_v16  ;;  %v1382_v16 = vld [vmem:[%s2374_s0 + $0x58] sm:$0xff] }
 0x557   :  { %976 = vmatpush1.bf16.msra.mxu0 %v1808_v12  ;;  %1017 = vmatpush1.bf16.msra.mxu1 %v1849_v19 }
 0x558   :  { %977 = vmatprep.subr.bf16.mxu0 %v1813_v13  ;;  %1018 = vmatprep.subr.bf16.mxu1 %v1855_v20 }
 0x55b   :  { %978 = vmatpush1.bf16.msra.mxu0 %v1837_v17  ;;  %1019 = vmatpush1.bf16.msra.mxu1 %v1873_v23 }
 0x55c   :  { %979 = vmatprep.subr.bf16.mxu0 %v1843_v18  ;;  %1020 = vmatprep.subr.bf16.mxu1 %v1879_v24 }
 0x55f   :  { %980 = vmatpush1.bf16.msra.mxu0 %v1861_v21  ;;  %1021 = vmatpush1.bf16.msra.mxu1 %v1897_v27 }
 0x560   :  { %981 = vmatprep.subr.bf16.mxu0 %v1866_v22  ;;  %1022 = vmatprep.subr.bf16.mxu1 %v1903_v28 }
 0x563   :  { %982 = vmatpush1.bf16.msra.mxu0 %v1885_v25  ;;  %1023 = vmatpush1.bf16.msra.mxu1 %v1916_v30 }
 0x564   :  { %983 = vmatprep.subr.bf16.mxu0 %v1891_v26  ;;  %1024 = vmatprep.subr.bf16.mxu1 %v1922_v31 }
 0x567   :  { %984 = vmatpush1.bf16.msra.mxu0 %v1909_v29  ;;  %1025 = vmatpush1.bf16.msra.mxu1 %v1929_v32 }
 0x568   :  { %1095 = vmatprep.subr.bf16.mxu0 %v1654_v1  ;;  %1136 = vmatprep.subr.bf16.mxu1 %v1772_v6  ;;  %v1683_v1 = vld [vmem:[%s2375_s1 + $0xe0] ss:$16 sps:$4 sm:$0xff]  }
 0x61d   :  { %v877_v3 = vpop.f32.mrb[20].mxu0  ;;  %v918_v4 = vpop.f32.mrb[20].mxu1 }
 0x61e   :  { %v879_v7 = vpop.f32.mrb[21].mxu0  ;;  %v920_v8 = vpop.f32.mrb[21].mxu1 }
 0x61f   :  { %v929_v9 = vcombine.low %v877_v3, %v879_v7  ;;  %v930_v10 = vcombine.low %v918_v4, %v920_v8  ;;  %v881_v11 = vpop.f32.mrb[22].mxu0  ;;  %v922_v12 = vpop.f32.mrb[22].mxu1  ;;  %v1684_v3 = vld [vmem:[%s2375_s1 + $0xe8] ss:$16 sps:$4 sm:$0xff]   ;;  %v1386_v7 = vld [vmem:[%s2374_s0 + $0x60] sm:$0xff] }
 0x620   :  { %v882_v13 = vpop.f32.mrb[23].mxu0  ;;  %v923_v14 = vpop.f32.mrb[23].mxu1 }
 0x621   :  { %v933_v15 = vadd.f32 %v1381_v5, %v929_v9  ;;  %v934_v19 = vadd.f32 %v1382_v16, %v930_v10 }
 0x623   :  { %v1383_v6 = vmul.f32 -1.442695, %v933_v15  ;;  %v942_v17 = vrot.slane %v933_v15, 4  ;;  %v952_v20 = vrot.slane %v934_v19, 4 }
 0x625   :  { %1606 = vpow2.f32 %v1383_v6  ;;  %v1384_v18 = vmul.f32 -1.442695, %v942_v17  ;;  %v1385_v21 = vmul.f32 -1.442695, %v952_v20  ;;  %v1387_v6 = vld [vmem:[%s2374_s0 + $0x68] sm:$0xff] }
 0x627   :  { %1608 = vpow2.f32 %v1384_v18 }
 0x628   :  { %1610 = vtanh.f32 %v934_v19 }
 0x629   :  { %1612 = vpow2.f32 %v1385_v21 }
 0x62f   :  { %v1607_v22 = vpop.eup %1606 }
 0x630   :  { %v938_v23 = vadd.f32 1.0, %v1607_v22 }
 0x631   :  { %v1609_v24 = vpop.eup %1608 }
 0x632   :  { %1614 = vrcp.f32 %v938_v23  ;;  %v947_v25 = vadd.f32 1.0, %v1609_v24  ;;  %v1611_v26 = vpop.eup %1610 }
 0x633   :  { %v1613_v27 = vpop.eup %1612 }
 0x634   :  { %1616 = vrcp.f32 %v947_v25  ;;  %v957_v31 = vadd.f32 1.0, %v1613_v27 }
 0x636   :  { %1618 = vrcp.f32 %v957_v31 }
 0x63c   :  { %v1615_v28 = vpop.eup %1614 }
 0x63d   :  { %v961_v29 = vmul.f32 %v1615_v28, %v1611_v26 }
 0x63e   :  { %v1617_v30 = vpop.eup %1616 }
 0x63f   :  { %v960_v32 = vmul.f32 %v1617_v30, %v2153_v49  ;;  %v1678_v49 = vld [vmem:[%s2375_s1 + $0xcc] ss:$16 sps:$4 sm:$0xff]  }
 0x640   :  { %v1619_v53 = vpop.eup %1618 }
 0x641   :  { %v2199_v37 = vadd.f32 %v961_v29, %v960_v32 }
 0x643   :  { %1620 = vtanh.f32 %v2199_v37 }
 0x64d   :  { %v1621_v54 = vpop.eup %1620 }
 0x64e   :  { %v964_v55 = vmul.f32 %v1621_v54, %v1619_v53 }
 0x650   :  { %v968_v56 = vpack.c.bf16 %v964_v55, %v964_v55 }
 0x652   :  { %1002 = vmatmul.mubr.bf16.vlgmr.msra.gmra.mrb[24].mxu0 %v968_v56  ;;  %1043 = vmatmul.mubr.bf16.vlgmr.msra.gmra.mrb[24].mxu1 %v968_v56 }
 0x653   :  { %1096 = vmatpush1.bf16.msra.mxu0 %v1655_v57  ;;  %1137 = vmatpush1.bf16.msra.mxu1 %v1656_v58 }
 0x654   :  { %1097 = vmatprep.subr.bf16.mxu0 %v1657_v59  ;;  %1138 = vmatprep.subr.bf16.mxu1 %v1658_v60  ;;  %v1217_v59 = vld [vmem:[%s2376_s2] sm:$0xff]  ;;  %v1218_v60 = vld [vmem:[%s2376_s2 + $0x8] sm:$0xff] }
 0x655   :  { %1127 = vmatprep.mubr.bf16.mxu0 %v1709_v2  ;;  %1168 = vmatprep.mubr.bf16.mxu1 %v1709_v2  ;;  %v1663_v2 = vld [vmem:[%s2375_s1 + $0x40] ss:$16 sps:$4 sm:$0xff]  }
 0x657   :  { %1098 = vmatpush1.bf16.msra.mxu0 %v1659_v0  ;;  %1139 = vmatpush1.bf16.msra.mxu1 %v1660_v61  ;;  %v1710_v0 = vmov 0.0|0.0   ;;  %v1219_v61 = vld [vmem:[%s2376_s2 + $0x10] sm:$0xff] }
 0x658   :  { %1099 = vmatprep.subr.bf16.mxu0 %v1661_v62  ;;  %1140 = vmatprep.subr.bf16.mxu1 %v1662_v33  ;;  %v1220_v62 = vld [vmem:[%s2376_s2 + $0x18] sm:$0xff] }
 0x659   :  { %v1453_v33 = vpack.c.bf16 %v1220_v62, %v1219_v61 }
 0x65b   :  { %1100 = vmatpush1.bf16.msra.mxu0 %v1663_v2  ;;  %1141 = vmatpush1.bf16.msra.mxu1 %v1664_v34  ;;  %v1221_v2 = vld [vmem:[%s2376_s2 + $0x20] sm:$0xff]  ;;  %v1222_v34 = vld [vmem:[%s2376_s2 + $0x28] sm:$0xff] }
 0x65c   :  { %1101 = vmatprep.subr.bf16.mxu0 %v1665_v35  ;;  %1142 = vmatprep.subr.bf16.mxu1 %v1666_v36  ;;  %v1456_v35 = vpack.c.bf16 %v1222_v34, %v1221_v2  ;;  %v1223_v36 = vld [vmem:[%s2376_s2 + $0x30] sm:$0xff] }
 0x65f   :  { %1102 = vmatpush1.bf16.msra.mxu0 %v1667_v38  ;;  %1143 = vmatpush1.bf16.msra.mxu1 %v1668_v39  ;;  %v1224_v38 = vld [vmem:[%s2376_s2 + $0x38] sm:$0xff] }
 0x660   :  { %1103 = vmatprep.subr.bf16.mxu0 %v1669_v40  ;;  %1144 = vmatprep.subr.bf16.mxu1 %v1670_v41  ;;  %v1459_v39 = vpack.c.bf16 %v1224_v38, %v1223_v36  ;;  %v1225_v40 = vld [vmem:[%s2376_s2 + $0x40] sm:$0xff]  ;;  %v1226_v41 = vld [vmem:[%s2376_s2 + $0x48] sm:$0xff] }
 0x663   :  { %1104 = vmatpush1.bf16.msra.mxu0 %v1671_v42  ;;  %1145 = vmatpush1.bf16.msra.mxu1 %v1672_v43  ;;  %v1462_v42 = vpack.c.bf16 %v1226_v41, %v1225_v40  ;;  %v1227_v43 = vld [vmem:[%s2376_s2 + $0x50] sm:$0xff] }
 0x664   :  { %1105 = vmatprep.subr.bf16.mxu0 %v1673_v44  ;;  %1146 = vmatprep.subr.bf16.mxu1 %v1674_v45  ;;  %v1228_v44 = vld [vmem:[%s2376_s2 + $0x58] sm:$0xff]  ;;  %v1229_v45 = vld [vmem:[%s2376_s2 + $0x60] sm:$0xff] }
 0x667   :  { %1106 = vmatpush1.bf16.msra.mxu0 %v1675_v46  ;;  %1147 = vmatpush1.bf16.msra.mxu1 %v1676_v47  ;;  %v1465_v46 = vpack.c.bf16 %v1228_v44, %v1227_v43  ;;  %v1230_v47 = vld [vmem:[%s2376_s2 + $0x68] sm:$0xff] }
 0x668   :  { %1107 = vmatprep.subr.bf16.mxu0 %v1677_v48  ;;  %1148 = vmatprep.subr.bf16.mxu1 %v1678_v49  ;;  %v1712_v48 = vmov 0.0   ;;  %v1468_v49 = vpack.c.bf16 %v1230_v47, %v1229_v45 }
 0x66b   :  { %1108 = vmatpush1.bf16.msra.mxu0 %v1679_v63  ;;  %1149 = vmatpush1.bf16.msra.mxu1 %v1680_v50  ;;  %v1231_v63 = vld [vmem:[%s2376_s2 + $0x70] sm:$0xff]  ;;  %v1232_v50 = vld [vmem:[%s2376_s2 + $0x78] sm:$0xff] }
 0x66c   :  { %1109 = vmatprep.subr.bf16.mxu0 %v1681_v51  ;;  %1150 = vmatprep.subr.bf16.mxu1 %v1682_v52  ;;  %v1471_v51 = vpack.c.bf16 %v1232_v50, %v1231_v63 }
 0x66f   :  { %1110 = vmatpush1.bf16.msra.mxu0 %v1683_v1  ;;  %1151 = vmatpush1.bf16.msra.mxu1 %v1684_v3  ;;  %v1391_v3 = vld [vmem:[%s2374_s0 + $0x70] sm:$0xff] }
 0x670   :  { %1449 = vmatprep.subr.bf16.mxu0 %v1710_v0 }
 0x725   :  { %v1003_v4 = vpop.f32.mrb[24].mxu0  ;;  %v1044_v5 = vpop.f32.mrb[24].mxu1 }
 0x726   :  { %v1005_v8 = vpop.f32.mrb[25].mxu0  ;;  %v1046_v9 = vpop.f32.mrb[25].mxu1 }
 0x727   :  { %v1055_v10 = vcombine.low %v1003_v4, %v1005_v8  ;;  %v1056_v11 = vcombine.low %v1044_v5, %v1046_v9  ;;  %v1007_v12 = vpop.f32.mrb[26].mxu0  ;;  %v1048_v13 = vpop.f32.mrb[26].mxu1 }
 0x728   :  { %v1008_v14 = vpop.f32.mrb[27].mxu0  ;;  %v1049_v15 = vpop.f32.mrb[27].mxu1 }
 0x729   :  { %v1059_v16 = vadd.f32 %v1386_v7, %v1055_v10  ;;  %v1060_v20 = vadd.f32 %v1387_v6, %v1056_v11  ;;  %v1392_v14 = vld [vmem:[%s2374_s0 + $0x78] sm:$0xff] }
 0x72b   :  { %v1388_v17 = vmul.f32 -1.442695, %v1059_v16  ;;  %v1068_v18 = vrot.slane %v1059_v16, 4  ;;  %v1078_v21 = vrot.slane %v1060_v20, 4 }
 0x72d   :  { %1622 = vpow2.f32 %v1388_v17  ;;  %v1389_v19 = vmul.f32 -1.442695, %v1068_v18  ;;  %v1390_v22 = vmul.f32 -1.442695, %v1078_v21 }
 0x72f   :  { %1624 = vpow2.f32 %v1389_v19 }
 0x730   :  { %1626 = vtanh.f32 %v1060_v20 }
 0x731   :  { %1628 = vpow2.f32 %v1390_v22 }
 0x737   :  { %v1623_v23 = vpop.eup %1622 }
 0x738   :  { %v1064_v24 = vadd.f32 1.0, %v1623_v23 }
 0x739   :  { %v1625_v25 = vpop.eup %1624 }
 0x73a   :  { %1630 = vrcp.f32 %v1064_v24  ;;  %v1073_v26 = vadd.f32 1.0, %v1625_v25  ;;  %v1627_v27 = vpop.eup %1626 }
 0x73b   :  { %v1629_v28 = vpop.eup %1628 }
 0x73c   :  { %1632 = vrcp.f32 %v1073_v26  ;;  %v1083_v32 = vadd.f32 1.0, %v1629_v28 }
 0x73e   :  { %1634 = vrcp.f32 %v1083_v32 }
 0x744   :  { %v1631_v29 = vpop.eup %1630 }
 0x745   :  { %v1087_v30 = vmul.f32 %v1631_v29, %v1627_v27 }
 0x746   :  { %v1633_v31 = vpop.eup %1632 }
 0x747   :  { %v1086_v53 = vmul.f32 %v1633_v31, %v2199_v37  ;;  %v1450_v37 = vpack.c.bf16 %v1218_v60, %v1217_v59 }
 0x748   :  { %v1635_v55 = vpop.eup %1634 }
 0x749   :  { %v2301_v54 = vadd.f32 %v1087_v30, %v1086_v53 }
 0x74b   :  { %1636 = vtanh.f32 %v2301_v54 }
 0x755   :  { %v1637_v56 = vpop.eup %1636 }
 0x756   :  { %v1090_v57 = vmul.f32 %v1637_v56, %v1635_v55  ;;  %v1396_v56 = vld [vmem:[%s2377_s3] ss:$0 sm:$0xff] }
 0x758   :  { %v1094_v58 = vpack.c.bf16 %v1090_v57, %v1090_v57 }
 0x75a   :  { %1128 = vmatmul.mubr.bf16.vlgmr.msra.gmra.mrb[28].mxu0 %v1094_v58  ;;  %1169 = vmatmul.mubr.bf16.vlgmr.msra.gmra.mrb[28].mxu1 %v1094_v58 }
 0x75b   :  { %1451 = vmatpush3.bf16.msra.mxu0 %v1450_v37  ;;  %1446 = vmatprep.mubr.msk.f32.mxu0 %vm1711_vm0, %v1712_v48 }
 0x75c   :  { %1452 = vmatprep.subr.bf16.mxu0 %v1710_v0 }
 0x75f   :  { %1454 = vmatpush3.bf16.msra.mxu0 %v1453_v33 }
 0x760   :  { %1455 = vmatprep.subr.bf16.mxu0 %v1710_v0 }
 0x763   :  { %1457 = vmatpush3.bf16.msra.mxu0 %v1456_v35 }
 0x764   :  { %1458 = vmatprep.subr.bf16.mxu0 %v1710_v0 }
 0x767   :  { %1460 = vmatpush3.bf16.msra.mxu0 %v1459_v39 }
 0x768   :  { %1461 = vmatprep.subr.bf16.mxu0 %v1710_v0 }
 0x76b   :  { %1463 = vmatpush3.bf16.msra.mxu0 %v1462_v42 }
 0x76c   :  { %1464 = vmatprep.subr.bf16.mxu0 %v1710_v0 }
 0x76f   :  { %1466 = vmatpush3.bf16.msra.mxu0 %v1465_v46 }
 0x770   :  { %1467 = vmatprep.subr.bf16.mxu0 %v1710_v0 }
 0x773   :  { %1469 = vmatpush3.bf16.msra.mxu0 %v1468_v49 }
 0x774   :  { %1470 = vmatprep.subr.bf16.mxu0 %v1710_v0 }
 0x777   :  { %1472 = vmatpush3.bf16.msra.mxu0 %v1471_v51 }
 0x82d   :  { %v1129_v52 = vpop.f32.mrb[28].mxu0  ;;  %v1170_v1 = vpop.f32.mrb[28].mxu1 }
 0x82e   :  { %v1131_v4 = vpop.f32.mrb[29].mxu0  ;;  %v1172_v5 = vpop.f32.mrb[29].mxu1 }
 0x82f   :  { %v1181_v7 = vcombine.low %v1129_v52, %v1131_v4  ;;  %v1182_v8 = vcombine.low %v1170_v1, %v1172_v5  ;;  %v1133_v9 = vpop.f32.mrb[30].mxu0  ;;  %v1174_v10 = vpop.f32.mrb[30].mxu1 }
 0x830   :  { %v1134_v11 = vpop.f32.mrb[31].mxu0  ;;  %v1175_v12 = vpop.f32.mrb[31].mxu1 }
 0x831   :  { %v1185_v13 = vadd.f32 %v1391_v3, %v1181_v7  ;;  %v1186_v17 = vadd.f32 %v1392_v14, %v1182_v8 }
 0x833   :  { %v1393_v15 = vmul.f32 -1.442695, %v1185_v13  ;;  %v1194_v16 = vrot.slane %v1185_v13, 4  ;;  %v1204_v18 = vrot.slane %v1186_v17, 4 }
 0x835   :  { %1638 = vpow2.f32 %v1393_v15  ;;  %v1394_v6 = vmul.f32 -1.442695, %v1194_v16  ;;  %v1395_v19 = vmul.f32 -1.442695, %v1204_v18 }
 0x837   :  { %1640 = vpow2.f32 %v1394_v6 }
 0x838   :  { %1642 = vtanh.f32 %v1186_v17 }
 0x839   :  { %1644 = vpow2.f32 %v1395_v19 }
 0x83f   :  { %v1639_v20 = vpop.eup %1638 }
 0x840   :  { %v1190_v21 = vadd.f32 1.0, %v1639_v20 }
 0x841   :  { %v1641_v22 = vpop.eup %1640 }
 0x842   :  { %1646 = vrcp.f32 %v1190_v21  ;;  %v1199_v23 = vadd.f32 1.0, %v1641_v22  ;;  %v1643_v24 = vpop.eup %1642 }
 0x843   :  { %v1645_v25 = vpop.eup %1644 }
 0x844   :  { %1648 = vrcp.f32 %v1199_v23  ;;  %v1209_v29 = vadd.f32 1.0, %v1645_v25 }
 0x846   :  { %1650 = vrcp.f32 %v1209_v29 }
 0x84c   :  { %v1647_v26 = vpop.eup %1646 }
 0x84d   :  { %v1213_v27 = vmul.f32 %v1647_v26, %v1643_v24 }
 0x84e   :  { %v1649_v28 = vpop.eup %1648 }
 0x84f   :  { %v1212_v30 = vmul.f32 %v1649_v28, %v2301_v54 }
 0x850   :  { %v1651_v32 = vpop.eup %1650 }
 0x851   :  { %v1214_v31 = vadd.f32 %v1213_v27, %v1212_v30 }
 0x853   :  { %1652 = vtanh.f32 %v1214_v31 }
 0x85d   :  { %v1653_v53 = vpop.eup %1652 }
 0x85e   :  { %v1216_v55 = vmul.f32 %v1653_v53, %v1651_v32 }
 0x860   :  { %1447 = vmatmul.mubr.f32.vlgmr.msra.gmra.mrb[32].mxu0 %v1216_v55 }
 0x933   :  { %v1306_v57 = vpop.f32.mrb[32].mxu0 }
 0x934   :  { %v1307_v58 = vadd.f32 %v1396_v56, %v1306_v57  ;;  %v1448_v59 = vpop.f32.mrb[33].mxu0 }
 0x936   :  { %1311 = vst.msk [vmem:[#allocation2] sm:$0xf] %vm1310_vm1, %v1307_v58 }
 0x937   :  { %1696 = shalt.err (!%p1693_p4)
}
 0x938   :  { %s1697_s26 = scalar_lea.hbm %s2378_s4, 64 }
 0x939   :  { %p1698_p5 = scmp.ne.s32.totalorder %s2378_s4, %s1697_s26  ;;  %p1701_p6 = scmp.lt.u32.totalorder %s1697_s26, %s2378_s4 }
 0x93b   :  { %p1703_p7 = pnand %p1701_p6, %p1698_p5 }
 0x93d   :  { %1706 = shalt.err (!%p1703_p7)
}
 0x93e   :  { %1321 = dma.vmem_to_hbm [thread:$0]  %s1319_s22, 64, %s2378_s4, [#allocation3]  }
 0x93f   :  { %1707 = dma.done.wait [#allocation3], 64  }
 0x940   :  { %1708 = vsyncadd [#allocation3], 4294967232 }
 0x941   :  { %1325 = vsyncpa [#allocation3], 1 }

</bundles_post_ra>
